<compile_context>
chip_gen: v6e
topology: v6e:2x2x1
jax: 0.10.0
libtpu: 0.0.40
codegen_flags: <defaults>
</compile_context>

<pallas_src>
import jax
import jax.numpy as jnp
from jax.experimental import pallas as pl
from jax.experimental.pallas import tpu as pltpu


NEG_SLOPE = 0.01  # nn.LeakyReLU default negative_slope


def _leaky(h):
    # max-form LeakyReLU: mul + max (2 VPU ops) instead of cmp + mul + select.
    # Identical to the where-form for all finite inputs.
    return jnp.maximum(h, NEG_SLOPE * h)


# --------------------------------------------------------------------------
# Kernel bodies
# --------------------------------------------------------------------------

def _mlp_kernel_mxu(x_ref,                 # (tm, 128) bf16, cols 3..127 zero
                    w1_ref, b1_ref,        # (128, 256) bf16, (1, 256) bf16
                    w2_ref, b2_ref,        # (256, 256) bf16, (1, 256) bf16
                    w3_ref, b3_ref,
                    w4_ref, b4_ref,
                    w5_ref,                # (256, 128) bf16, cols 1..127 zero
                    out_ref):              # (tm, 128) f32; column 0 = result
    """v6e/v7x path: all five layers on the MXU, bf16 epilogues."""
    h = x_ref[...]
    for w_ref, b_ref in ((w1_ref, b1_ref), (w2_ref, b2_ref),
                         (w3_ref, b3_ref), (w4_ref, b4_ref)):
        acc = jnp.dot(h, w_ref[...], preferred_element_type=jnp.float32)
        t = acc.astype(jnp.bfloat16) + b_ref[...]      # bf16 epilogue
        h = _leaky(t)
    # Layer 5 also on the MXU -> lane-dense unmasked stores (col 0 = y).
    out_ref[...] = jnp.dot(h, w5_ref[...], preferred_element_type=jnp.float32)


def _mlp_kernel_vpu(x_ref,                                  # (tm, 8) f32, cols 3..7 zero
                    w1r0_ref, w1r1_ref, w1r2_ref, b1_ref,   # (1, 256) f32 each
                    w2_ref, b2_ref,                         # (256,256) bf16, (1,256) f32
                    w3_ref, b3_ref,
                    w4_ref, b4_ref,
                    w5_ref,                                 # (1, 256) f32
                    out_ref):                               # (tm, 1) f32
    """v5e path: keep degenerate layers 1/5 off the (slower) MXU, f32 VPU."""
    h = (x_ref[:, 0:1] * w1r0_ref[...]
         + x_ref[:, 1:2] * w1r1_ref[...]
         + x_ref[:, 2:3] * w1r2_ref[...]
         + b1_ref[...])                                     # (tm, 256) f32
    h = _leaky(h)
    for w_ref, b_ref in ((w2_ref, b2_ref), (w3_ref, b3_ref), (w4_ref, b4_ref)):
        acc = jnp.dot(h.astype(jnp.bfloat16), w_ref[...],
                      preferred_element_type=jnp.float32)
        h = _leaky(acc + b_ref[...])
    out_ref[...] = jnp.sum(h * w5_ref[...], axis=-1, keepdims=True)


# --------------------------------------------------------------------------
# Wrapper
# --------------------------------------------------------------------------

def _round_up(a, m):
    return ((a + m - 1) // m) * m


def _pick_tm(n, *, tm_max=2048, min_tiles=2):
    """Large tile (amortize ~600-cycle step overhead) but keep >= min_tiles
    grid steps so v7x's two TensorCores both get work."""
    tm = min(tm_max, _round_up(max(1, -(-n // min_tiles)), 256))
    return max(tm, 256)


def _resident(arr):
    # Full-array block, same block index every grid step -> stays in VMEM.
    return pl.BlockSpec(arr.shape, lambda i: (0,) * arr.ndim)


def neural_fem_constraint(x, params, *, tm=None, use_mxu_path=None):
    """Forward pass of the 5-layer MLP.

    x:       (N, 3) float32
    params:  list of 5 (W, b), W in (in, out) layout, float32
    returns: (N, 1) float32
    """
    N, D = x.shape
    assert D == 3
    if use_mxu_path is None:
        # v5e: slower MXU is the scarce unit and its VPU has no bf16 path.
        use_mxu_path = "v5" not in jax.devices()[0].device_kind.lower()
    if tm is None:
        tm = _pick_tm(N)
    assert tm % 256 == 0, "keep the batch tile MXU/vreg aligned on all chips"

    (w1, b1), (w2, b2), (w3, b3), (w4, b4), (w5, b5) = params

    num_tiles = -(-N // tm)
    n_pad = num_tiles * tm

    bf = jnp.bfloat16
    w2b, w3b, w4b = (w.astype(bf) for w in (w2, w3, w4))

    if use_mxu_path:
        # Layers 1 & 5 on the MXU: pad x to 128 lanes (lane-dense, single DMA),
        # pad w1/w5 with zero rows/cols -> padded terms contribute exactly 0.
        xk = jnp.pad(x, ((0, n_pad - N), (0, 125))).astype(bf)       # (n_pad, 128)
        w1p = jnp.zeros((128, 256), bf).at[:3, :].set(w1.astype(bf))
        w5p = jnp.zeros((256, 128), bf).at[:, :1].set(w5.astype(bf))
        b1b, b2b, b3b, b4b = (b.astype(bf) for b in (b1, b2, b3, b4))
        operands = (xk, w1p, b1b, w2b, b2b, w3b, b3b, w4b, b4b, w5p)
        kernel = _mlp_kernel_mxu
        x_spec = pl.BlockSpec((tm, 128), lambda i: (i, 0))
        out_spec = pl.BlockSpec((tm, 128), lambda i: (i, 0))
        out_shape = jax.ShapeDtypeStruct((n_pad, 128), jnp.float32)
        flops = 2 * n_pad * (128 * 256 + 3 * 256 * 256 + 256 * 128)
    else:
        xk = jnp.pad(x, ((0, n_pad - N), (0, 5)))                     # (n_pad, 8) f32
        w1r0, w1r1, w1r2 = w1[0:1, :], w1[1:2, :], w1[2:3, :]
        w5r = w5.reshape(1, -1)                                        # (1, 256)
        operands = (xk, w1r0, w1r1, w1r2, b1, w2b, b2, w3b, b3, w4b, b4, w5r)
        kernel = _mlp_kernel_vpu
        x_spec = pl.BlockSpec((tm, 8), lambda i: (i, 0))
        out_spec = pl.BlockSpec((tm, 1), lambda i: (i, 0))
        out_shape = jax.ShapeDtypeStruct((n_pad, 1), jnp.float32)
        flops = 2 * n_pad * (3 * 256 + 3 * 256 * 256 + 256)

    in_specs = [x_spec] + [_resident(a) for a in operands[1:]]
    bytes_accessed = sum(int(a.size) * a.dtype.itemsize for a in operands)
    bytes_accessed += n_pad * out_shape.shape[1] * 4

    out = pl.pallas_call(
        kernel,
        out_shape=out_shape,
        grid_spec=pltpu.PrefetchScalarGridSpec(
            num_scalar_prefetch=0,
            grid=(num_tiles,),
            in_specs=in_specs,
            out_specs=out_spec,
        ),
        compiler_params=pltpu.CompilerParams(
            # Batch tiles are independent -> shard across v7x's two TCs.
            dimension_semantics=("parallel",)),
        cost_estimate=pl.CostEstimate(
            flops=flops, transcendentals=0, bytes_accessed=bytes_accessed),
    )(*operands)

    # Column 0 is the MLP output (the MXU path's extra columns are padding);
    # final bias added here (plain XLA scalar add), padded rows sliced off.
    return out[:N, 0:1] + b5


# --------------------------------------------------------------------------
# Parameter init (mirrors the PyTorch module) and a pure-JAX reference
# --------------------------------------------------------------------------

def init_params(key):
    """xavier_uniform_ on the (out, in) weight, then divide each row by its
    norm (dim=1, keepdim); biases keep the default nn.Linear uniform init.
    Weights returned transposed to (in, out) for the kernel layout."""
    dims = [(3, 256), (256, 256), (256, 256), (256, 256), (256, 1)]
    params = []
    for (fan_in, fan_out) in dims:
        key, kw, kb = jax.random.split(key, 3)
        limit = jnp.sqrt(6.0 / (fan_in + fan_out))
        w_oi = jax.random.uniform(kw, (fan_out, fan_in), jnp.float32,
                                  minval=-limit, maxval=limit)
        w_oi = w_oi / jnp.linalg.norm(w_oi, axis=1, keepdims=True)
        bound = 1.0 / jnp.sqrt(jnp.float32(fan_in))
        b = jax.random.uniform(kb, (1, fan_out), jnp.float32,
                               minval=-bound, maxval=bound)
        params.append((jnp.transpose(w_oi), b))   # (in, out), (1, out)
    return params


def reference_forward(x, params, *, use_mxu_path=True):
    """Pure-JAX reference mirroring the kernel numerics for each path."""
    (w1, b1), (w2, b2), (w3, b3), (w4, b4), (w5, b5) = params
    bf = jnp.bfloat16
    if use_mxu_path:
        h = x.astype(bf)
        for w, b in ((w1, b1), (w2, b2), (w3, b3), (w4, b4)):
            acc = jnp.dot(h, w.astype(bf), preferred_element_type=jnp.float32)
            t = acc.astype(bf) + b.astype(bf)
            h = jnp.maximum(t, NEG_SLOPE * t)
        out = jnp.dot(h, w5.astype(bf), preferred_element_type=jnp.float32)
        return out + b5
    else:
        h = x @ w1 + b1
        h = jnp.maximum(h, NEG_SLOPE * h)
        for w, b in ((w2, b2), (w3, b3), (w4, b4)):
            acc = jnp.dot(h.astype(bf), w.astype(bf),
                          preferred_element_type=jnp.float32)
            t = acc + b
            h = jnp.maximum(t, NEG_SLOPE * t)
        return h @ w5 + b5


if __name__ == "__main__":
    key = jax.random.PRNGKey(0)
    kx, kp = jax.random.split(key)

    N = 300                                  # not a tile multiple: exercises padding
    x = jax.random.normal(kx, (N, 3), jnp.float32)
    params = init_params(kp)

    use_mxu = "v5" not in jax.devices()[0].device_kind.lower()

    # Auto tile (tm=256 here -> 2 grid steps: exercises the multi-tile path).
    out = neural_fem_constraint(x, params, use_mxu_path=use_mxu)
    out = jax.block_until_ready(out)

    # Forced larger tile (single grid step path).
    out_single = neural_fem_constraint(x, params, tm=512, use_mxu_path=use_mxu)
    out_single = jax.block_until_ready(out_single)

    ref = reference_forward(x, params, use_mxu_path=use_mxu)
    assert out.shape == (N, 1)
    assert jnp.allclose(out, ref, atol=1e-2, rtol=1e-2), "mismatch vs reference"
    assert jnp.allclose(out_single, ref, atol=1e-2, rtol=1e-2), "mismatch (single tile)"

    print("KERNEL_OK")
</pallas_src>

<mosaic_0001>
module attributes {stable_mosaic.version = 11 : i64} {
  func.func @_mlp_kernel_mxu(%arg0: i32, %arg1: memref<256x128xbf16, #tpu.memory_space<vmem>>, %arg2: memref<128x256xbf16, #tpu.memory_space<vmem>>, %arg3: memref<1x256xbf16, #tpu.memory_space<vmem>>, %arg4: memref<256x256xbf16, #tpu.memory_space<vmem>>, %arg5: memref<1x256xbf16, #tpu.memory_space<vmem>>, %arg6: memref<256x256xbf16, #tpu.memory_space<vmem>>, %arg7: memref<1x256xbf16, #tpu.memory_space<vmem>>, %arg8: memref<256x256xbf16, #tpu.memory_space<vmem>>, %arg9: memref<1x256xbf16, #tpu.memory_space<vmem>>, %arg10: memref<256x128xbf16, #tpu.memory_space<vmem>>, %arg11: memref<256x128xf32, #tpu.memory_space<vmem>>) attributes {dimension_semantics = [#tpu.dimension_semantics<parallel>], iteration_bounds = array<i64: 2>, scalar_prefetch = 0 : i64, scratch_operands = 0 : i64, tpu.core_type = #tpu.core_type<tc>, window_params = [{transform_indices = @transform_0, window_bounds = array<i64: 256, 128>}, {pipeline_mode = #tpu.pipeline_mode<synchronous>, transform_indices = @transform_1, window_bounds = array<i64: 128, 256>}, {pipeline_mode = #tpu.pipeline_mode<synchronous>, transform_indices = @transform_2, window_bounds = array<i64: 1, 256>}, {pipeline_mode = #tpu.pipeline_mode<synchronous>, transform_indices = @transform_3, window_bounds = array<i64: 256, 256>}, {pipeline_mode = #tpu.pipeline_mode<synchronous>, transform_indices = @transform_4, window_bounds = array<i64: 1, 256>}, {pipeline_mode = #tpu.pipeline_mode<synchronous>, transform_indices = @transform_5, window_bounds = array<i64: 256, 256>}, {pipeline_mode = #tpu.pipeline_mode<synchronous>, transform_indices = @transform_6, window_bounds = array<i64: 1, 256>}, {pipeline_mode = #tpu.pipeline_mode<synchronous>, transform_indices = @transform_7, window_bounds = array<i64: 256, 256>}, {pipeline_mode = #tpu.pipeline_mode<synchronous>, transform_indices = @transform_8, window_bounds = array<i64: 1, 256>}, {pipeline_mode = #tpu.pipeline_mode<synchronous>, transform_indices = @transform_9, window_bounds = array<i64: 256, 128>}, {transform_indices = @transform_10, window_bounds = array<i64: 256, 128>}]} {
    %c0 = arith.constant 0 : index
    %c0_0 = arith.constant 0 : index
    %0 = vector.load %arg1[%c0, %c0_0] : memref<256x128xbf16, #tpu.memory_space<vmem>>, vector<256x128xbf16>
    %c0_1 = arith.constant 0 : index
    %c0_2 = arith.constant 0 : index
    %1 = vector.load %arg2[%c0_1, %c0_2] : memref<128x256xbf16, #tpu.memory_space<vmem>>, vector<128x256xbf16>
    %cst = arith.constant dense<0.000000e+00> : vector<256x256xf32>
    %2 = tpu.matmul %0, %1, %cst {dimension_numbers = #tpu.dot_dimension_numbers<[1], [0], [0], [1], [0, 0, 1, 1], [], []>} : vector<256x128xbf16>, vector<128x256xbf16>, vector<256x256xf32> -> vector<256x256xf32>
    %3 = arith.truncf %2 : vector<256x256xf32> to vector<256x256xbf16>
    %c0_3 = arith.constant 0 : index
    %c0_4 = arith.constant 0 : index
    %4 = vector.load %arg3[%c0_3, %c0_4] : memref<1x256xbf16, #tpu.memory_space<vmem>>, vector<1x256xbf16>
    %5 = vector.broadcast %4 : vector<1x256xbf16> to vector<256x256xbf16>
    %6 = arith.addf %3, %5 : vector<256x256xbf16>
    %cst_5 = arith.constant 1.000980e-02 : bf16
    %7 = vector.broadcast %cst_5 : bf16 to vector<256x256xbf16>
    %8 = arith.mulf %7, %6 : vector<256x256xbf16>
    %9 = arith.maximumf %6, %8 : vector<256x256xbf16>
    %c0_6 = arith.constant 0 : index
    %c0_7 = arith.constant 0 : index
    %10 = vector.load %arg4[%c0_6, %c0_7] : memref<256x256xbf16, #tpu.memory_space<vmem>>, vector<256x256xbf16>
    %cst_8 = arith.constant dense<0.000000e+00> : vector<256x256xf32>
    %11 = tpu.matmul %9, %10, %cst_8 {dimension_numbers = #tpu.dot_dimension_numbers<[1], [0], [0], [1], [0, 0, 1, 1], [], []>} : vector<256x256xbf16>, vector<256x256xbf16>, vector<256x256xf32> -> vector<256x256xf32>
    %12 = arith.truncf %11 : vector<256x256xf32> to vector<256x256xbf16>
    %c0_9 = arith.constant 0 : index
    %c0_10 = arith.constant 0 : index
    %13 = vector.load %arg5[%c0_9, %c0_10] : memref<1x256xbf16, #tpu.memory_space<vmem>>, vector<1x256xbf16>
    %14 = vector.broadcast %13 : vector<1x256xbf16> to vector<256x256xbf16>
    %15 = arith.addf %12, %14 : vector<256x256xbf16>
    %cst_11 = arith.constant 1.000980e-02 : bf16
    %16 = vector.broadcast %cst_11 : bf16 to vector<256x256xbf16>
    %17 = arith.mulf %16, %15 : vector<256x256xbf16>
    %18 = arith.maximumf %15, %17 : vector<256x256xbf16>
    %c0_12 = arith.constant 0 : index
    %c0_13 = arith.constant 0 : index
    %19 = vector.load %arg6[%c0_12, %c0_13] : memref<256x256xbf16, #tpu.memory_space<vmem>>, vector<256x256xbf16>
    %cst_14 = arith.constant dense<0.000000e+00> : vector<256x256xf32>
    %20 = tpu.matmul %18, %19, %cst_14 {dimension_numbers = #tpu.dot_dimension_numbers<[1], [0], [0], [1], [0, 0, 1, 1], [], []>} : vector<256x256xbf16>, vector<256x256xbf16>, vector<256x256xf32> -> vector<256x256xf32>
    %21 = arith.truncf %20 : vector<256x256xf32> to vector<256x256xbf16>
    %c0_15 = arith.constant 0 : index
    %c0_16 = arith.constant 0 : index
    %22 = vector.load %arg7[%c0_15, %c0_16] : memref<1x256xbf16, #tpu.memory_space<vmem>>, vector<1x256xbf16>
    %23 = vector.broadcast %22 : vector<1x256xbf16> to vector<256x256xbf16>
    %24 = arith.addf %21, %23 : vector<256x256xbf16>
    %cst_17 = arith.constant 1.000980e-02 : bf16
    %25 = vector.broadcast %cst_17 : bf16 to vector<256x256xbf16>
    %26 = arith.mulf %25, %24 : vector<256x256xbf16>
    %27 = arith.maximumf %24, %26 : vector<256x256xbf16>
    %c0_18 = arith.constant 0 : index
    %c0_19 = arith.constant 0 : index
    %28 = vector.load %arg8[%c0_18, %c0_19] : memref<256x256xbf16, #tpu.memory_space<vmem>>, vector<256x256xbf16>
    %cst_20 = arith.constant dense<0.000000e+00> : vector<256x256xf32>
    %29 = tpu.matmul %27, %28, %cst_20 {dimension_numbers = #tpu.dot_dimension_numbers<[1], [0], [0], [1], [0, 0, 1, 1], [], []>} : vector<256x256xbf16>, vector<256x256xbf16>, vector<256x256xf32> -> vector<256x256xf32>
    %30 = arith.truncf %29 : vector<256x256xf32> to vector<256x256xbf16>
    %c0_21 = arith.constant 0 : index
    %c0_22 = arith.constant 0 : index
    %31 = vector.load %arg9[%c0_21, %c0_22] : memref<1x256xbf16, #tpu.memory_space<vmem>>, vector<1x256xbf16>
    %32 = vector.broadcast %31 : vector<1x256xbf16> to vector<256x256xbf16>
    %33 = arith.addf %30, %32 : vector<256x256xbf16>
    %cst_23 = arith.constant 1.000980e-02 : bf16
    %34 = vector.broadcast %cst_23 : bf16 to vector<256x256xbf16>
    %35 = arith.mulf %34, %33 : vector<256x256xbf16>
    %36 = arith.maximumf %33, %35 : vector<256x256xbf16>
    %c0_24 = arith.constant 0 : index
    %c0_25 = arith.constant 0 : index
    %37 = vector.load %arg10[%c0_24, %c0_25] : memref<256x128xbf16, #tpu.memory_space<vmem>>, vector<256x128xbf16>
    %cst_26 = arith.constant dense<0.000000e+00> : vector<256x128xf32>
    %38 = tpu.matmul %36, %37, %cst_26 {dimension_numbers = #tpu.dot_dimension_numbers<[1], [0], [0], [1], [0, 0, 1, 1], [], []>} : vector<256x256xbf16>, vector<256x128xbf16>, vector<256x128xf32> -> vector<256x128xf32>
    %c0_27 = arith.constant 0 : index
    %c0_28 = arith.constant 0 : index
    %39 = vector.load %arg11[%c0_27, %c0_28] : memref<256x128xf32, #tpu.memory_space<vmem>>, vector<256x128xf32>
    tpu.vector_store %arg11[%c0_27, %c0_28], %38 {strides = array<i32>} : memref<256x128xf32, #tpu.memory_space<vmem>>, vector<256x128xf32>,
    return
  }
  func.func @transform_0(%arg0: i32) -> (i32, i32) {
    %c0_i32 = arith.constant 0 : i32
    %c0_i32_0 = arith.constant 0 : i32
    return %arg0, %c0_i32 : i32, i32
  }
  func.func @transform_1(%arg0: i32) -> (i32, i32) {
    %c0_i32 = arith.constant 0 : i32
    %c0_i32_0 = arith.constant 0 : i32
    %c0_i32_1 = arith.constant 0 : i32
    return %c0_i32, %c0_i32_0 : i32, i32
  }
  func.func @transform_2(%arg0: i32) -> (i32, i32) {
    %c0_i32 = arith.constant 0 : i32
    %c0_i32_0 = arith.constant 0 : i32
    %c0_i32_1 = arith.constant 0 : i32
    return %c0_i32, %c0_i32_0 : i32, i32
  }
  func.func @transform_3(%arg0: i32) -> (i32, i32) {
    %c0_i32 = arith.constant 0 : i32
    %c0_i32_0 = arith.constant 0 : i32
    %c0_i32_1 = arith.constant 0 : i32
    return %c0_i32, %c0_i32_0 : i32, i32
  }
  func.func @transform_4(%arg0: i32) -> (i32, i32) {
    %c0_i32 = arith.constant 0 : i32
    %c0_i32_0 = arith.constant 0 : i32
    %c0_i32_1 = arith.constant 0 : i32
    return %c0_i32, %c0_i32_0 : i32, i32
  }
  func.func @transform_5(%arg0: i32) -> (i32, i32) {
    %c0_i32 = arith.constant 0 : i32
    %c0_i32_0 = arith.constant 0 : i32
    %c0_i32_1 = arith.constant 0 : i32
    return %c0_i32, %c0_i32_0 : i32, i32
  }
  func.func @transform_6(%arg0: i32) -> (i32, i32) {
    %c0_i32 = arith.constant 0 : i32
    %c0_i32_0 = arith.constant 0 : i32
    %c0_i32_1 = arith.constant 0 : i32
    return %c0_i32, %c0_i32_0 : i32, i32
  }
  func.func @transform_7(%arg0: i32) -> (i32, i32) {
    %c0_i32 = arith.constant 0 : i32
    %c0_i32_0 = arith.constant 0 : i32
    %c0_i32_1 = arith.constant 0 : i32
    return %c0_i32, %c0_i32_0 : i32, i32
  }
  func.func @transform_8(%arg0: i32) -> (i32, i32) {
    %c0_i32 = arith.constant 0 : i32
    %c0_i32_0 = arith.constant 0 : i32
    %c0_i32_1 = arith.constant 0 : i32
    return %c0_i32, %c0_i32_0 : i32, i32
  }
  func.func @transform_9(%arg0: i32) -> (i32, i32) {
    %c0_i32 = arith.constant 0 : i32
    %c0_i32_0 = arith.constant 0 : i32
    %c0_i32_1 = arith.constant 0 : i32
    return %c0_i32, %c0_i32_0 : i32, i32
  }
  func.func @transform_10(%arg0: i32) -> (i32, i32) {
    %c0_i32 = arith.constant 0 : i32
    %c0_i32_0 = arith.constant 0 : i32
    return %arg0, %c0_i32 : i32, i32
  }
}

</mosaic_0001>

<bundles_post_ra>
// kernel: tpu_custom_call.1
= control target key start
LH: loop header
LB: loop body
LE: loop exit
PB: predicated region body
PF: predicated region fallthrough
CT: control target
= control target key end

     0   :  { %s4615_s0 = inlined_call_operand.hbm [shape: bf16[512,128], index: 0, kind: input, shape index: {}]   ;;  %s4616_s1 = inlined_call_operand.hbm [shape: bf16[128,256], index: 1, kind: input, shape index: {}]   ;;  %s4617_s2 = inlined_call_operand.vmem [shape: bf16[1,256], index: 2, kind: input, shape index: {}]   ;;  %s4618_s3 = inlined_call_operand.hbm [shape: bf16[256,256], index: 3, kind: input, shape index: {}]   ;;  %s4619_s4 = inlined_call_operand.vmem [shape: bf16[1,256], index: 4, kind: input, shape index: {}]   ;;  %s4620_s5 = inlined_call_operand.hbm [shape: bf16[256,256], index: 5, kind: input, shape index: {}]   ;;  %s4621_s6 = inlined_call_operand.vmem [shape: bf16[1,256], index: 6, kind: input, shape index: {}]   ;;  %s4622_s7 = inlined_call_operand.hbm [shape: bf16[256,256], index: 7, kind: input, shape index: {}]   ;;  %s4623_s8 = inlined_call_operand.vmem [shape: bf16[1,256], index: 8, kind: input, shape index: {}]   ;;  %s4624_s9 = inlined_call_operand.hbm [shape: bf16[256,128], index: 9, kind: input, shape index: {}]   ;;  %s4625_s10 = inlined_call_operand.hbm [shape: f32[512,128], index: 10, kind: output, shape index: {}]  }
   0x1   :  { %4632 = sst [smem:[#allocation19_spill]] %s4616_s1 }
   0x2   :  { %4633 = sst [smem:[#allocation20_spill]] %s4618_s3 }
   0x3   :  { %4634 = sst [smem:[#allocation21_spill]] %s4620_s5 }
   0x4   :  { %4635 = sst [smem:[#allocation22_spill]] %s4622_s7 }
   0x5   :  { %15 = vsyncpa [#allocation3], 0 }
   0x6   :  { %17 = vsyncpa [#allocation3 + $0x1], 0 }
   0x7   :  { %18 = vsyncpa [#allocation6], 0 }
   0x8   :  { %19 = vsyncpa [#allocation9], 0 }
   0x9   :  { %20 = vsyncpa [#allocation12], 0 }
   0xa   :  { %21 = vsyncpa [#allocation4], 0 }
   0xb   :  { %23 = vsyncpa [#allocation4 + $0x1], 0  ;;  %s4060_s13 = smov 0   ;;  %s4062_s14 = smov 0  }
   0xc   :  { %s4064_s15 = smov 0   ;;  %s4066_s16 = smov 0  }
   0xd LB: > { %s3990_s17 = smov [#allocation5]   ;;  %s4081_s19 = sadd.s32 4294967295, %s3988_s16   ;;  %s3988_s16 = sphi %s4066_s16, %s4663_s16   ;;  %s3984_s15 = sphi %s4064_s15, %s4662_s15   ;;  %s3980_s14 = sphi %s4062_s14, %s4661_s14   ;;  %s3976_s13 = sphi %s4060_s13, %s4660_s13  }
   0xe   : > { %s287_s18 = sshll.u32 %s3990_s17, 4  ;;  %p3148_p0 = scmp.ge.s32.totalorder %s3988_s16, 1  ;;  %s288_s18 = int_to_ptr.vmem [resolvable:$true] %s287_s18 }
   0xf   : > { %p4628_p1 = scmp.eq.s32.totalorder %s4081_s19, 0  ;;  %p275_p2 = scmp.lt.s32.totalorder %s3988_s16, 3 }
  0x10   : > { %s3991_s21 = smov [#allocation8]   ;;  %s3992_s24 = smov [#allocation7]  }
  0x11   : > { %p4086_p3 = pnand %p3148_p0, %p275_p2  ;;  %s319_s22 = sshll.u32 %s3991_s21, 4  ;;  %s4099_s22 = int_to_ptr.vmem [resolvable:$true] %s319_s22 }
  0x12   : > { %s303_s25 = sshll.u32 %s3992_s24, 4  ;;  %s3765_s27 = scalar_lea.vmem %s288_s18, 2048  ;;  %s4101_s25 = int_to_ptr.vmem [resolvable:$true] %s303_s25 }
  0x13   : > { %s4636_s20 = scalar_select %p4086_p3, 1, 0 }
  0x14   : > { %p3473_p5 = pneg %p4086_p3  ;;  %p3766_p8 = scmp.ne.s32.totalorder %s288_s18, %s3765_s27 }
  0x15   : > { %p3773_p11 = scmp.lt.s32.totalorder %s288_s18, %s288_s18  ;;  %p3774_p12 = scmp.lt.s32.totalorder %s3765_s27, %s3765_s27 }
  0x16   : > { %p4095_p6 = pnand %p3473_p5, %p4628_p1 }
  0x17   : > { %p3775_p13 = por %p3774_p12, %p3773_p11 }
  0x18   : > { %p4105_p7 = pneg %p4095_p6 }
  0x1a   : > { %p3768_p9 = pnand %p3766_p8, %p4105_p7 }
  0x1c   : > { %p3769_p10 = pneg %p3768_p9 }
  0x1e   : > { %p3776_p0 = pnand %p3775_p13, %p3769_p10 }
  0x20   : > { %3779 = shalt.err (!%p3776_p0)
}
  0x21   : > { %s3993_s28 = smov 128   ;;  %s3994_s29 = smov 8  }
  0x22   : > { %s4639_s1 = sld [smem:[#allocation19_spill]]  ;;  %s3791_s12 = scalar_lea.vmem %s4099_s22, 4096 }
  0x23   : > { %p3792_p2 = scmp.ne.s32.totalorder %s4099_s22, %s3791_s12  ;;  %p3799_p9 = scmp.lt.s32.totalorder %s4099_s22, %s4099_s22 }
  0x24   : > { %p3800_p10 = scmp.lt.s32.totalorder %s3791_s12, %s3791_s12 }
  0x25   : > { %p3794_p5 = pnand %p3792_p2, %p4105_p7 }
  0x26   : > { %p3801_p11 = por %p3800_p10, %p3799_p9 }
  0x27   : > { %p3795_p8 = pneg %p3794_p5 }
  0x28   : > { %3476 = dma.hbm_to_vmem [thread:$0]  (!%p4095_p6), %s4639_s1, 2048, %s288_s18, [#allocation6], %s3993_s28, %s3993_s28, %s3994_s29  }
  0x29   : > { %p3802_p12 = pnand %p3801_p11, %p3795_p8 }
  0x2b   : > { %3805 = shalt.err (!%p3802_p12)
}
  0x2c   : > { %s4640_s5 = sld [smem:[#allocation21_spill]]  ;;  %s3817_s18 = scalar_lea.vmem %s4101_s25, 4096 }
  0x2d   : > { %p3818_p13 = scmp.ne.s32.totalorder %s4101_s25, %s3817_s18  ;;  %p3825_p5 = scmp.lt.s32.totalorder %s4101_s25, %s4101_s25 }
  0x2e   : > { %p3826_p8 = scmp.lt.s32.totalorder %s3817_s18, %s3817_s18 }
  0x2f   : > { %p3820_p0 = pnand %p3818_p13, %p4105_p7 }
  0x30   : > { %p3827_p9 = por %p3826_p8, %p3825_p5 }
  0x31   : > { %p3821_p2 = pneg %p3820_p0 }
  0x32   : > { %3482 = dma.hbm_to_vmem [thread:$0]  (!%p4095_p6), %s4640_s5, 4096, %s4099_s22, [#allocation9], %s3993_s28, %s3993_s28, %s3994_s29  }
  0x33   : > { %p3828_p10 = pnand %p3827_p9, %p3821_p2 }
  0x35   : > { %3831 = shalt.err (!%p3828_p10)
}
  0x36   : > { %s4641_s3 = sld [smem:[#allocation20_spill]]  ;;  %s3995_s22 = smov [#allocation10]  }
  0x37   : > { %s335_s30 = sshll.u32 %s3995_s22, 4  ;;  %s3996_s11 = smov [#allocation11]   ;;  %s336_s30 = int_to_ptr.vmem [resolvable:$true] %s335_s30 }
  0x38   : > { %s351_s12 = sshll.u32 %s3996_s11, 4  ;;  %s3843_s17 = scalar_lea.vmem %s336_s30, 4096  ;;  %s352_s12 = int_to_ptr.vmem [resolvable:$true] %s351_s12 }
  0x39   : > { %p3844_p11 = scmp.ne.s32.totalorder %s336_s30, %s3843_s17  ;;  %p3851_p0 = scmp.lt.s32.totalorder %s336_s30, %s336_s30 }
  0x3a   : > { %p3852_p2 = scmp.lt.s32.totalorder %s3843_s17, %s3843_s17 }
  0x3b   : > { %p3846_p12 = pnand %p3844_p11, %p4105_p7 }
  0x3c   : > { %3479 = dma.hbm_to_vmem [thread:$0]  (!%p4095_p6), %s4641_s3, 4096, %s4101_s25, [#allocation6], %s3993_s28, %s3993_s28, %s3994_s29  }
  0x3d   : > { %p3847_p13 = pneg %p3846_p12  ;;  %p3853_p5 = por %p3852_p2, %p3851_p0 }
  0x3f   : > { %p3854_p8 = pnand %p3853_p5, %p3847_p13 }
  0x41   : > { %3857 = shalt.err (!%p3854_p8)
}
  0x42   : > { %s4642_s7 = sld [smem:[#allocation22_spill]]  ;;  %s3869_s18 = scalar_lea.vmem %s352_s12, 2048 }
  0x43   : > { %p3870_p9 = scmp.ne.s32.totalorder %s352_s12, %s3869_s18  ;;  %p3877_p12 = scmp.lt.s32.totalorder %s352_s12, %s352_s12 }
  0x44   : > { %p3878_p0 = scmp.lt.s32.totalorder %s3869_s18, %s3869_s18 }
  0x45   : > { %p3872_p10 = pnand %p3870_p9, %p4105_p7 }
  0x46   : > { %p3879_p13 = por %p3878_p0, %p3877_p12 }
  0x47   : > { %p3873_p11 = pneg %p3872_p10 }
  0x48   : > { %3485 = dma.hbm_to_vmem [thread:$0]  (!%p4095_p6), %s4642_s7, 4096, %s336_s30, [#allocation9], %s3993_s28, %s3993_s28, %s3994_s29  }
  0x49   : > { %p3880_p2 = pnand %p3879_p13, %p3873_p11 }
  0x4b   : > { %3883 = shalt.err (!%p3880_p2)
}
  0x4c   : > { %s4626_s24 = smov 64   ;;  %s4627_s26 = smov 4  }
  0x4d   : > { %3488 = dma.hbm_to_vmem [thread:$0]  (!%p4095_p6), %s4624_s9, 2048, %s352_s12, [#allocation12], %s4626_s24, %s4626_s24, %s4627_s26  }
  0x4e   : > { %s3147_s27 = sadd.s32 4294967294, %s3988_s16   ;;  %s4171_s22 = sadd.s32 1, %s3988_s16  }
  0x4f   : > { %s36_s30 = sadd.s32 1, %s3984_s15  ;;  %s33_s11 = ssub.s32 %s3988_s16, %s4171_s22 }
  0x50   : > { %p43_p7 = scmp.ne.s32.totalorder %s3984_s15, %s3980_s14  ;;  %p34_p5 = scmp.eq.s32.totalorder %s33_s11, 0 }
  0x51   : > { %p44_p8 = scmp.eq.s32.totalorder %s3988_s16, 0  ;;  %p49_p9 = scmp.ne.s32.totalorder %s3980_s14, %s3976_s13 }
  0x52   : > { %p262_p10 = scmp.eq.s32.totalorder %s4081_s19, 1  ;;  %p268_p0 = scmp.eq.s32.totalorder %s3147_s27, 1 }
  0x53   : > { %s4183_s23 = scalar_select %p34_p5, %s3984_s15, %s36_s30  }
  0x54   : > { %p45_p11 = por %p44_p8, %p43_p7  ;;  %p4187_p12 = por %p4628_p1, %p49_p9 }
  0x55   : > { %p4191_p6 = por %p262_p10, %p43_p7  ;;  %p3502_p13 = scmp.lt.s32.totalorder %s3988_s16, 2 }
  0x56   : > { %s4643_s17 = scalar_select %p4187_p12, 1, 0 }
  0x57   : > { %s4644_s12 = scalar_select %p4191_p6, 1, 0 }
  0x58   : > { %s365_s25 = sand.u32 1, %s3984_s15   ;;  %p4197_p2 = por %p268_p0, %p49_p9 }
  0x59   : > { %s3155_s18 = sshll.u32 %s365_s25, 7  ;;  %s3319_s28 = sshll.u32 %s3988_s16, 11 }
  0x5a   : > { %s4645_s21 = scalar_select %p4197_p2, 1, 0 }
  0x5b   : > { %s4205_s11 = scalar_lea.hbm %s4615_s0, %s3319_s28  ;;  %s369_s24 = scalar_lea.vmem [#allocation2], %s3155_s18 }
  0x5c   : > { %s376_s26 = sshll.u32 %s369_s24, 4  ;;  %p4207_p7 = pnand %p3502_p13, %p45_p11  ;;  %s4211_s26 = int_to_ptr.vmem [resolvable:$true] %s376_s26 }
  0x5d   : > { %s4213_s1 = scalar_lea.sflag [#allocation3], %s365_s25  ;;  %s3884_s3 = scalar_lea.hbm %s4205_s11, 2048 }
  0x5e   : > { %p3885_p5 = scmp.ne.s32.totalorder %s4205_s11, %s3884_s3  ;;  %p3886_p8 = pneg %p4207_p7 }
  0x5f   : > { %s3889_s18 = scalar_lea.hbm %s4615_s0, 4096  ;;  %p3890_p11 = scmp.lt.s32.totalorder %s4205_s11, %s4615_s0 }
  0x60   : > { %p3887_p9 = pnand %p3886_p8, %p3885_p5  ;;  %p3891_p0 = scmp.lt.s32.totalorder %s3889_s18, %s3884_s3 }
  0x62   : > { %p3888_p10 = pneg %p3887_p9  ;;  %p3892_p13 = por %p3891_p0, %p3890_p11 }
  0x64   : > { %p3893_p4 = pnand %p3892_p13, %p3888_p10 }
  0x66   : > { %3896 = shalt.err (!%p3893_p4)
}
  0x67   : > { %s3897_s25 = scalar_lea.vmem %s4211_s26, 2048  ;;  %s3999_s5 = smov [#allocation2]  }
  0x68   : > { %p3898_p1 = scmp.ne.s32.totalorder %s4211_s26, %s3897_s25  ;;  %s3902_s7 = sshll.u32 %s3999_s5, 4  ;;  %s3903_s7 = int_to_ptr.vmem [resolvable:$false] %s3902_s7 }
  0x69   : > { %s3904_s28 = scalar_lea.vmem %s3903_s7, 4096  ;;  %p3905_p9 = scmp.lt.s32.totalorder %s4211_s26, %s3903_s7 }
  0x6a   : > { %p3900_p2 = pnand %p3898_p1, %p3886_p8  ;;  %p3906_p6 = scmp.lt.s32.totalorder %s3904_s28, %s3897_s25 }
  0x6c   : > { %p3901_p5 = pneg %p3900_p2  ;;  %p3907_p12 = por %p3906_p6, %p3905_p9 }
  0x6e   : > { %p3908_p3 = pnand %p3907_p12, %p3901_p5 }
  0x70   : > { %3911 = shalt.err (!%p3908_p3)
}
  0x71   : > { %s4647_s3 = smov 4   ;;  %s4648_s29 = smov 64  }
  0x72   : > { %3492 = dma.hbm_to_vmem [thread:$0]  (!%p4207_p7), %s4205_s11, 2048, %s4211_s26, %s4213_s1, %s4648_s29, %s4648_s29, %s4647_s3  }
  0x73   : > { %p4649_p1 = scmp.ne.s32.totalorder %s4636_s20, 0 }
  0x74   : > { %s4240_s5 = sand.u32 (!%p4649_p1), 1, %s3980_s14   ;;  %p4650_p3 = scmp.ne.s32.totalorder (!%p4649_p1), %s4643_s17, 0 }
  0x75   : > { %388 = sbr.rel (%p4649_p1) target bundleno = 1334 (0x536), region = 60  ;;  %s3159_s7 = sshll.u32 (!%p4649_p1), %s4240_s5, 7 }
  0x76   : > { %s391_s18 = scalar_lea.sflag (!%p4649_p1), [#allocation3], %s4240_s5  ;;  %s4244_s24 = scalar_lea.vmem (!%p4649_p1), [#allocation2], %s3159_s7 }
  0x7a   : > { %3955 = dma.done.wait (%p4650_p3), %s391_s18, 2048  }
  0x7b   : > { %3957 = vsyncadd (%p4650_p3), %s391_s18, 4294965248  ;;  %p4651_p4 = scmp.eq.s32.totalorder %s4081_s19, 0 }
  0x7d   : > { %3959 = dma.done.wait (%p4651_p4), [#allocation6], 6144   ;;  %p4652_p12 = pmov %p4651_p4 }
  0x7e   : > { %p4653_p6 = pmov %p4651_p4 }
  0x7f   : > { %3961 = vsyncadd (%p4652_p12), [#allocation6], 4294961152 }
  0x80   : > { %3963 = dma.done.wait (%p4653_p6), [#allocation9], 8192   ;;  %p4654_p2 = pmov %p4651_p4 }
  0x82   : > { %3965 = vsyncadd (%p4654_p2), [#allocation9], 4294959104  ;;  %p4655_p7 = pmov %p4654_p2 }
  0x83   : > { %p4656_p8 = pmov %p4654_p2 }
  0x84   : > { %3967 = dma.done.wait (%p4655_p7), [#allocation12], 2048  }
  0x85   : > { %3969 = vsyncadd (%p4656_p8), [#allocation12], 4294965248  ;;  %v4000_v0 = vmov 0   ;;  %v3554_v1 = vld [vmem:[#allocation5 + $0x74] ss:$8 sps:$4 sm:$0xff]   ;;  %v3578_v18 = vld [vmem:[%s4244_s24] sm:$0xff]  }
  0x86   : > { %711 = vmatprep.mubr.bf16.mxu0 %v4000_v0  ;;  %791 = vmatprep.mubr.bf16.mxu1 %v4000_v0  ;;  %v3556_v2 = vld [vmem:[#allocation5 + $0x70] ss:$8 sps:$4 sm:$0xff]   ;;  %v3557_v3 = vld [vmem:[#allocation5 + $0x64] ss:$8 sps:$4 sm:$0xff]   ;;  %v3559_v4 = vld [vmem:[#allocation5 + $0x60] ss:$8 sps:$4 sm:$0xff]  }
  0x87   : > { %679 = vmatprep.subr.bf16.mxu0 %v3554_v1  ;;  %3433 = vmatprep.subr.bf16.mxu1 %v3554_v1  ;;  %v3560_v5 = vld [vmem:[#allocation5 + $0x54] ss:$8 sps:$4 sm:$0xff]   ;;  %v3562_v6 = vld [vmem:[#allocation5 + $0x50] ss:$8 sps:$4 sm:$0xff]   ;;  %v3563_v7 = vld [vmem:[#allocation5 + $0x44] ss:$8 sps:$4 sm:$0xff]  }
  0x88   : > { %680 = vmatpush1.bf16.msra.mxu0 %v3556_v2  ;;  %3441 = vmatpush1.bf16.msra.mxu1 %v3556_v2  ;;  %v3565_v8 = vld [vmem:[#allocation5 + $0x40] ss:$8 sps:$4 sm:$0xff]   ;;  %v3566_v9 = vld [vmem:[#allocation5 + $0x34] ss:$8 sps:$4 sm:$0xff]   ;;  %v3568_v10 = vld [vmem:[#allocation5 + $0x30] ss:$8 sps:$4 sm:$0xff]  }
  0x89   : > { %681 = vmatprep.subr.bf16.mxu0 %v3557_v3  ;;  %3434 = vmatprep.subr.bf16.mxu1 %v3557_v3  ;;  %v3569_v11 = vld [vmem:[#allocation5 + $0x24] ss:$8 sps:$4 sm:$0xff]   ;;  %v3571_v12 = vld [vmem:[#allocation5 + $0x20] ss:$8 sps:$4 sm:$0xff]   ;;  %v3572_v13 = vld [vmem:[#allocation5 + $0x14] ss:$8 sps:$4 sm:$0xff]  }
  0x8a   : > { %v3574_v14 = vld [vmem:[#allocation5 + $0x10] ss:$8 sps:$4 sm:$0xff]   ;;  %v3575_v15 = vld [vmem:[#allocation5 + $0x4] ss:$8 sps:$4 sm:$0xff]   ;;  %v3577_v16 = vld [vmem:[#allocation5] ss:$8 sps:$4 sm:$0xff]  }
  0x8b   : > { %v3596_v17 = vld [vmem:[#allocation7 + $0x74] ss:$8 sps:$4 sm:$0xff]   ;;  %v3586_v19 = vld [vmem:[%s4244_s24 + $0x40] sm:$0xff]   ;;  %v3594_v20 = vld [vmem:[#allocation7 + $0x70] ss:$8 sps:$4 sm:$0xff]   ;;  %s3165_s28 = sshll.u32 %s4240_s5, 8 }
  0x8c   : > { %682 = vmatpush1.bf16.msra.mxu0 %v3559_v4  ;;  %3442 = vmatpush1.bf16.msra.mxu1 %v3559_v4  ;;  %v3599_v21 = vld [vmem:[#allocation7 + $0x64] ss:$8 sps:$4 sm:$0xff]   ;;  %v3597_v22 = vld [vmem:[#allocation7 + $0x60] ss:$8 sps:$4 sm:$0xff]   ;;  %v3602_v23 = vld [vmem:[#allocation7 + $0x54] ss:$8 sps:$4 sm:$0xff]  }
  0x8d   : > { %683 = vmatprep.subr.bf16.mxu0 %v3560_v5  ;;  %3435 = vmatprep.subr.bf16.mxu1 %v3560_v5  ;;  %v3579_v24 = vld [vmem:[%s4244_s24 + $0x8] sm:$0xff]   ;;  %v3600_v26 = vld [vmem:[#allocation7 + $0x50] ss:$8 sps:$4 sm:$0xff]   ;;  %v3608_v29 = vld [vmem:[#allocation7 + $0x34] ss:$8 sps:$4 sm:$0xff]   ;;  %s4531_s3 = scalar_lea.vmem [#allocation13], %s3165_s28 }
  0x8e   : > { %v3587_v25 = vld [vmem:[%s4244_s24 + $0x48] sm:$0xff]   ;;  %v3580_v30 = vld [vmem:[%s4244_s24 + $0x10] sm:$0xff]   ;;  %v3581_v36 = vld [vmem:[%s4244_s24 + $0x18] sm:$0xff]   ;;  %v4001_v2 = vmov 1966171168   ;;  %s3320_s29 = sshll.u32 %s4081_s19, 12 }
  0x8f   : > { %v3605_v27 = vld [vmem:[#allocation7 + $0x44] ss:$8 sps:$4 sm:$0xff]   ;;  %v3603_v28 = vld [vmem:[#allocation7 + $0x40] ss:$8 sps:$4 sm:$0xff]   ;;  %v3588_v31 = vld [vmem:[%s4244_s24 + $0x50] sm:$0xff]   ;;  %v915_v3 = vunpack.c.l.s4 %v4001_v2  ;;  %s3026_s7 = sshll.u32 %s4531_s3, 4  ;;  %s4569_s1 = scalar_lea.hbm %s4625_s10, %s3320_s29  ;;  %s4571_s7 = int_to_ptr.vmem [resolvable:$true] %s3026_s7 }
  0x90   : > { %684 = vmatpush1.bf16.msra.mxu0 %v3562_v6  ;;  %3443 = vmatpush1.bf16.msra.mxu1 %v3562_v6  ;;  %v3606_v32 = vld [vmem:[#allocation7 + $0x30] ss:$8 sps:$4 sm:$0xff]   ;;  %v3611_v33 = vld [vmem:[#allocation7 + $0x24] ss:$8 sps:$4 sm:$0xff]   ;;  %v3609_v34 = vld [vmem:[#allocation7 + $0x20] ss:$8 sps:$4 sm:$0xff]  }
  0x91   : > { %685 = vmatprep.subr.bf16.mxu0 %v3563_v7  ;;  %3436 = vmatprep.subr.bf16.mxu1 %v3563_v7  ;;  %v3614_v35 = vld [vmem:[#allocation7 + $0x14] ss:$8 sps:$4 sm:$0xff]   ;;  %v3612_v38 = vld [vmem:[#allocation7 + $0x10] ss:$8 sps:$4 sm:$0xff]   ;;  %v3617_v39 = vld [vmem:[#allocation7 + $0x4] ss:$8 sps:$4 sm:$0xff]   ;;  %v916_v4 = vunpack.c.0.s8 %v915_v3 }
  0x92   : > { %v3589_v37 = vld [vmem:[%s4244_s24 + $0x58] sm:$0xff]   ;;  %v3615_v40 = vld [vmem:[#allocation7] ss:$8 sps:$4 sm:$0xff]   ;;  %v3623_v45 = vld [vmem:[#allocation7 + $0xe4] ss:$8 sps:$4 sm:$0xff]   ;;  %s3013_s20 = scalar_lea.sflag [#allocation4], %s4240_s5 }
  0x93   : > { %v3620_v41 = vld [vmem:[#allocation7 + $0xf4] ss:$8 sps:$4 sm:$0xff]   ;;  %v3582_v42 = vld [vmem:[%s4244_s24 + $0x20] sm:$0xff]   ;;  %v3618_v44 = vld [vmem:[#allocation7 + $0xf0] ss:$8 sps:$4 sm:$0xff]   ;;  %s3912_s26 = scalar_lea.vmem %s4571_s7, 4096 }
  0x94   : > { %686 = vmatpush1.bf16.msra.mxu0 %v3565_v8  ;;  %3444 = vmatpush1.bf16.msra.mxu1 %v3565_v8  ;;  %v3590_v43 = vld [vmem:[%s4244_s24 + $0x60] sm:$0xff]   ;;  %v3626_v47 = vld [vmem:[#allocation7 + $0xd4] ss:$8 sps:$4 sm:$0xff]   ;;  %v3583_v48 = vld [vmem:[%s4244_s24 + $0x28] sm:$0xff]   ;;  %p3913_p10 = scmp.ne.s32.totalorder %s4571_s7, %s3912_s26  ;;  %p4657_p11 = scmp.ne.s32.totalorder %s4644_s12, 0 }
  0x95   : > { %687 = vmatprep.subr.bf16.mxu0 %v3566_v9  ;;  %3437 = vmatprep.subr.bf16.mxu1 %v3566_v9  ;;  %v3621_v46 = vld [vmem:[#allocation7 + $0xe0] ss:$8 sps:$4 sm:$0xff]   ;;  %v3624_v50 = vld [vmem:[#allocation7 + $0xd0] ss:$8 sps:$4 sm:$0xff]   ;;  %v3629_v51 = vld [vmem:[#allocation7 + $0xc4] ss:$8 sps:$4 sm:$0xff]  }
  0x96   : > { %v3591_v49 = vld [vmem:[%s4244_s24 + $0x68] sm:$0xff]   ;;  %v3632_v53 = vld [vmem:[#allocation7 + $0xb4] ss:$8 sps:$4 sm:$0xff]   ;;  %v3630_v56 = vld [vmem:[#allocation7 + $0xb0] ss:$8 sps:$4 sm:$0xff]   ;;  %p3914_p0 = pnand %p3913_p10, %p4657_p11  ;;  %s4002_s19 = smov [#allocation13]  }
  0x97   : > { %v3627_v52 = vld [vmem:[#allocation7 + $0xc0] ss:$8 sps:$4 sm:$0xff]   ;;  %v3584_v54 = vld [vmem:[%s4244_s24 + $0x30] sm:$0xff]   ;;  %v3585_v57 = vld [vmem:[%s4244_s24 + $0x38] sm:$0xff]   ;;  %s3916_s17 = sshll.u32 %s4002_s19, 4  ;;  %s3917_s17 = int_to_ptr.vmem [resolvable:$false] %s3916_s17 }
  0x98   : > { %688 = vmatpush1.bf16.msra.mxu0 %v3568_v10  ;;  %3445 = vmatpush1.bf16.msra.mxu1 %v3568_v10  ;;  %v3592_v55 = vld [vmem:[%s4244_s24 + $0x70] sm:$0xff]   ;;  %v3593_v58 = vld [vmem:[%s4244_s24 + $0x78] sm:$0xff]   ;;  %v3633_v59 = vld [vmem:[#allocation7 + $0xa0] ss:$8 sps:$4 sm:$0xff]   ;;  %p3915_p13 = pneg %p3914_p0  ;;  %s3918_s11 = scalar_lea.vmem %s3917_s17, 8192 }
  0x99   : > { %689 = vmatprep.subr.bf16.mxu0 %v3569_v11  ;;  %3438 = vmatprep.subr.bf16.mxu1 %v3569_v11  ;;  %v3635_v60 = vld [vmem:[#allocation7 + $0xa4] ss:$8 sps:$4 sm:$0xff]   ;;  %v3638_v61 = vld [vmem:[#allocation7 + $0x94] ss:$8 sps:$4 sm:$0xff]   ;;  %v3636_v62 = vld [vmem:[#allocation7 + $0x90] ss:$8 sps:$4 sm:$0xff]   ;;  %p3919_p5 = scmp.lt.s32.totalorder %s4571_s7, %s3917_s17  ;;  %p3920_p9 = scmp.lt.s32.totalorder %s3918_s11, %s3912_s26 }
  0x9a   : > { %v3641_v63 = vld [vmem:[#allocation7 + $0x84] ss:$8 sps:$4 sm:$0xff]   ;;  %v3639_v1 = vld [vmem:[#allocation7 + $0x80] ss:$8 sps:$4 sm:$0xff]  }
  0x9b   : > { %v3198_v6 = vld.sshfl [vmem:[%s4617_s2] sm:$0x11 pattern:$0x75316420]  ;;  %p3921_p1 = por %p3920_p9, %p3919_p5 }
  0x9c   : > { %690 = vmatpush1.bf16.msra.mxu0 %v3571_v12  ;;  %3446 = vmatpush1.bf16.msra.mxu1 %v3571_v12  ;;  %v913_v8 = vcombine.high %v3198_v6, %v3198_v6 }
  0x9d   : > { %691 = vmatprep.subr.bf16.mxu0 %v3572_v13  ;;  %3439 = vmatprep.subr.bf16.mxu1 %v3572_v13  ;;  %p3922_p3 = pnand %p3921_p1, %p3915_p13 }
  0xa0   : > { %692 = vmatpush1.bf16.msra.mxu0 %v3574_v14  ;;  %3447 = vmatpush1.bf16.msra.mxu1 %v3574_v14 }
  0xa1   : > { %693 = vmatprep.subr.bf16.mxu0 %v3575_v15  ;;  %3440 = vmatprep.subr.bf16.mxu1 %v3575_v15 }
  0xa4   : > { %694 = vmatpush1.bf16.msra.mxu0 %v3577_v16  ;;  %3448 = vmatpush1.bf16.msra.mxu1 %v3577_v16 }
  0xa5   : > { %1230 = vmatprep.subr.bf16.mxu1 %v3596_v17 }
  0xa7   : > { %712 = vmatmul.mubr.bf16.vlgmr.msra.gmra.mxu0 %v3578_v18  ;;  %792 = vmatmul.mubr.bf16.vlgmr.msra.gmra.mxu1 %v3586_v19 }
  0xa8   : > { %721 = vmatprep.mubr.bf16.mxu0 %v4000_v0  ;;  %801 = vmatprep.mubr.bf16.mxu1 %v4000_v0 }
  0xa9   : > { %1231 = vmatpush1.bf16.msra.mxu1 %v3594_v20 }
  0xaa   : > { %1232 = vmatprep.subr.bf16.mxu1 %v3599_v21 }
  0xad   : > { %1233 = vmatpush1.bf16.msra.mxu1 %v3597_v22 }
  0xae   : > { %1234 = vmatprep.subr.bf16.mxu1 %v3602_v23 }
  0xaf   : > { %722 = vmatmul.mubr.bf16.gmra.mxu0 %v3579_v24  ;;  %802 = vmatmul.mubr.bf16.gmra.mxu1 %v3587_v25 }
  0xb0   : > { %731 = vmatprep.mubr.bf16.mxu0 %v4000_v0  ;;  %811 = vmatprep.mubr.bf16.mxu1 %v4000_v0 }
  0xb1   : > { %1235 = vmatpush1.bf16.msra.mxu1 %v3600_v26 }
  0xb2   : > { %1236 = vmatprep.subr.bf16.mxu1 %v3605_v27 }
  0xb5   : > { %1237 = vmatpush1.bf16.msra.mxu1 %v3603_v28 }
  0xb6   : > { %1238 = vmatprep.subr.bf16.mxu1 %v3608_v29  ;;  %v3642_v29 = vld [vmem:[#allocation8 + $0x70] ss:$8 sps:$4 sm:$0xff]  }
  0xb7   : > { %732 = vmatmul.mubr.bf16.gmra.mxu0 %v3580_v30  ;;  %812 = vmatmul.mubr.bf16.gmra.mxu1 %v3588_v31  ;;  %v3644_v30 = vld [vmem:[#allocation8 + $0x74] ss:$8 sps:$4 sm:$0xff]  }
  0xb8   : > { %741 = vmatprep.mubr.bf16.mxu0 %v4000_v0  ;;  %821 = vmatprep.mubr.bf16.mxu1 %v4000_v0 }
  0xb9   : > { %1239 = vmatpush1.bf16.msra.mxu1 %v3606_v32  ;;  %v3647_v32 = vld [vmem:[#allocation8 + $0x64] ss:$8 sps:$4 sm:$0xff]   ;;  %1781 = vmatprep.subr.bf16.mxu0 %v3644_v30  ;;  %v3660_v30 = vld [vmem:[#allocation8 + $0x10] ss:$8 sps:$4 sm:$0xff]  }
  0xba   : > { %1240 = vmatprep.subr.bf16.mxu1 %v3611_v33  ;;  %1782 = vmatpush1.bf16.msra.mxu0 %v3642_v29 }
  0xbb   : > { %1783 = vmatprep.subr.bf16.mxu0 %v3647_v32  ;;  %v3665_v32 = vld [vmem:[#allocation8 + $0x4] ss:$8 sps:$4 sm:$0xff]  }
  0xbd   : > { %1241 = vmatpush1.bf16.msra.mxu1 %v3609_v34 }
  0xbe   : > { %1242 = vmatprep.subr.bf16.mxu1 %v3614_v35 }
  0xbf   : > { %742 = vmatmul.mubr.bf16.gmra.mxu0 %v3581_v36  ;;  %822 = vmatmul.mubr.bf16.gmra.mxu1 %v3589_v37 }
  0xc0   : > { %751 = vmatprep.mubr.bf16.mxu0 %v4000_v0  ;;  %831 = vmatprep.mubr.bf16.mxu1 %v4000_v0 }
  0xc1   : > { %1243 = vmatpush1.bf16.msra.mxu1 %v3612_v38 }
  0xc2   : > { %1244 = vmatprep.subr.bf16.mxu1 %v3617_v39  ;;  %v3645_v39 = vld [vmem:[#allocation8 + $0x60] ss:$8 sps:$4 sm:$0xff]  }
  0xc3   : > { %1784 = vmatpush1.bf16.msra.mxu0 %v3645_v39 }
  0xc5   : > { %1245 = vmatpush1.bf16.msra.mxu1 %v3615_v40 }
  0xc6   : > { %1246 = vmatprep.subr.bf16.mxu1 %v3620_v41 }
  0xc7   : > { %752 = vmatmul.mubr.bf16.gmra.mxu0 %v3582_v42  ;;  %832 = vmatmul.mubr.bf16.gmra.mxu1 %v3590_v43  ;;  %v3650_v42 = vld [vmem:[#allocation8 + $0x54] ss:$8 sps:$4 sm:$0xff]  }
  0xc8   : > { %761 = vmatprep.mubr.bf16.mxu0 %v4000_v0  ;;  %841 = vmatprep.mubr.bf16.mxu1 %v4000_v0 }
  0xc9   : > { %1247 = vmatpush2.bf16.msra.mxu1 %v3618_v44  ;;  %1785 = vmatprep.subr.bf16.mxu0 %v3650_v42 }
  0xca   : > { %1248 = vmatprep.subr.bf16.mxu1 %v3623_v45 }
  0xcd   : > { %1249 = vmatpush2.bf16.msra.mxu1 %v3621_v46 }
  0xce   : > { %1250 = vmatprep.subr.bf16.mxu1 %v3626_v47 }
  0xcf   : > { %762 = vmatmul.mubr.bf16.gmra.mxu0 %v3583_v48  ;;  %842 = vmatmul.mubr.bf16.gmra.mxu1 %v3591_v49  ;;  %v3648_v49 = vld [vmem:[#allocation8 + $0x50] ss:$8 sps:$4 sm:$0xff]  }
  0xd0   : > { %771 = vmatprep.mubr.bf16.mxu0 %v4000_v0  ;;  %851 = vmatprep.mubr.bf16.mxu1 %v4000_v0 }
  0xd1   : > { %1251 = vmatpush2.bf16.msra.mxu1 %v3624_v50  ;;  %1786 = vmatpush1.bf16.msra.mxu0 %v3648_v49 }
  0xd2   : > { %1252 = vmatprep.subr.bf16.mxu1 %v3629_v51  ;;  %v3653_v51 = vld [vmem:[#allocation8 + $0x44] ss:$8 sps:$4 sm:$0xff]  }
  0xd3   : > { %1787 = vmatprep.subr.bf16.mxu0 %v3653_v51  ;;  %v3666_v51 = vld [vmem:[#allocation8 + $0xf0] ss:$8 sps:$4 sm:$0xff]  }
  0xd5   : > { %1253 = vmatpush2.bf16.msra.mxu1 %v3627_v52 }
  0xd6   : > { %1254 = vmatprep.subr.bf16.mxu1 %v3632_v53 }
  0xd7   : > { %772 = vmatmul.mubr.bf16.gmra.mxu0 %v3584_v54  ;;  %852 = vmatmul.mubr.bf16.gmra.mxu1 %v3592_v55 }
  0xd8   : > { %781 = vmatprep.mubr.bf16.mxu0 %v4000_v0  ;;  %861 = vmatprep.mubr.bf16.mxu1 %v4000_v0  ;;  %v917_v0 = vlaneseq }
  0xd9   : > { %1255 = vmatpush2.bf16.msra.mxu1 %v3630_v56 }
  0xda   : > { %1256 = vmatprep.subr.bf16.mxu1 %v3635_v60  ;;  %v918_v5 = vshrl.u32 %v917_v0, 7  ;;  %v3656_v60 = vld [vmem:[#allocation8 + $0x34] ss:$8 sps:$4 sm:$0xff]   ;;  %v3654_v0 = vld [vmem:[#allocation8 + $0x30] ss:$8 sps:$4 sm:$0xff]  }
  0xdc   : > { %v4297_v7 = vsub.s32 %v916_v4, %v918_v5  ;;  %v4301_v12 = vsub.s32 0, %v918_v5  ;;  %v3659_v5 = vld [vmem:[#allocation8 + $0x24] ss:$8 sps:$4 sm:$0xff]  }
  0xdd   : > { %1257 = vmatpush2.bf16.msra.mxu1 %v3633_v59 }
  0xde   : > { %1258 = vmatprep.subr.bf16.mxu1 %v3638_v61  ;;  %v920_v9 = vrot.slane %v3198_v6, %v4297_v7  ;;  %v927_v10 = vrot.slane %v913_v8, %v4297_v7 }
  0xdf   : > { %782 = vmatmul.mubr.bf16.gmra.mxu0 %v3585_v57  ;;  %862 = vmatmul.mubr.bf16.gmra.mxu1 %v3593_v58  ;;  %v3651_v57 = vld [vmem:[#allocation8 + $0x40] ss:$8 sps:$4 sm:$0xff]  }
  0xe0   : > { %v929_v11 = vpack.i.b16 %v920_v9, %v920_v9  ;;  %v936_v15 = vpack.i.b16 %v927_v10, %v927_v10  ;;  %1788 = vmatpush1.bf16.msra.mxu0 %v3651_v57 }
  0xe1   : > { %1259 = vmatpush2.bf16.msra.mxu1 %v3636_v62  ;;  %1789 = vmatprep.subr.bf16.mxu0 %v3656_v60  ;;  %v3669_v60 = vld [vmem:[#allocation8 + $0xe0] ss:$8 sps:$4 sm:$0xff]  }
  0xe2   : > { %1260 = vmatprep.subr.bf16.mxu1 %v3641_v63  ;;  %v4308_v18 = vrot.slane %v929_v11, %v4301_v12  ;;  %v4313_v22 = vrot.slane %v936_v15, %v4301_v12 }
  0xe4   : > { %1790 = vmatpush1.bf16.msra.mxu0 %v3654_v0 }
  0xe5   : > { %1261 = vmatpush2.bf16.msra.mxu1 %v3639_v1  ;;  %1791 = vmatprep.subr.bf16.mxu0 %v3659_v5 }
 0x167   : > { %v713_v13 = vpop.f32.mrf.mxu0  ;;  %v4303_v14 = vpop.f32.mrf.mxu1 }
 0x169   : > { %v715_v16 = vpop.f32.mrf.mxu0  ;;  %v4305_v17 = vpop.f32.mrf.mxu1 }
 0x16b   : > { %v717_v19 = vpop.f32.mrf.mxu0  ;;  %v4310_v20 = vpop.f32.mrf.mxu1 }
 0x16c   : > { %v872_v21 = vpack.c.bf16 %v717_v19, %v713_v13  ;;  %v3657_v13 = vld [vmem:[#allocation8 + $0x20] ss:$8 sps:$4 sm:$0xff]   ;;  %v3662_v19 = vld [vmem:[#allocation8 + $0x14] ss:$8 sps:$4 sm:$0xff]  }
 0x16d   : > { %v719_v23 = vpop.f32.mrf.mxu0  ;;  %v4315_v24 = vpop.f32.mrf.mxu1  ;;  %1792 = vmatpush1.bf16.msra.mxu0 %v3657_v13 }
 0x16e   : > { %v942_v25 = vadd.bf16 %v4308_v18, %v872_v21  ;;  %v873_v26 = vpack.c.bf16 %v719_v23, %v715_v16  ;;  %1793 = vmatprep.subr.bf16.mxu0 %v3662_v19 }
 0x16f   : > { %v723_v27 = vpop.f32.mrf.mxu0  ;;  %v4318_v28 = vpop.f32.mrf.mxu1 }
 0x170   : > { %v943_v31 = vadd.bf16 %v4313_v22, %v873_v26  ;;  %v974_v33 = vmul.bf16 1009007652, %v942_v25 }
 0x171   : > { %v725_v34 = vpop.f32.mrf.mxu0  ;;  %v4321_v35 = vpop.f32.mrf.mxu1  ;;  %1794 = vmatpush1.bf16.msra.mxu0 %v3660_v30 }
 0x172   : > { %v975_v36 = vmul.bf16 1009007652, %v943_v31  ;;  %v1006_v43 = vmax.bf16 %v974_v33, %v942_v25  ;;  %1795 = vmatprep.subr.bf16.mxu0 %v3665_v32 }
 0x173   : > { %v727_v37 = vpop.f32.mrf.mxu0  ;;  %v4323_v38 = vpop.f32.mrf.mxu1 }
 0x174   : > { %v874_v40 = vpack.c.bf16 %v727_v37, %v723_v27  ;;  %v1007_v41 = vmax.bf16 %v975_v36, %v943_v31 }
 0x175   : > { %v729_v44 = vpop.f32.mrf.mxu0  ;;  %v4326_v48 = vpop.f32.mrf.mxu1 }
 0x176   : > { %v944_v45 = vadd.bf16 %v4308_v18, %v874_v40  ;;  %v875_v46 = vpack.c.bf16 %v729_v44, %v725_v34  ;;  %1262 = vmatprep.mubr.bf16.mxu1 %v1007_v41  ;;  %v3663_v40 = vld [vmem:[#allocation8] ss:$8 sps:$4 sm:$0xff]  }
 0x177   : > { %v733_v47 = vpop.f32.mrf.mxu0  ;;  %1263 = vmatmul.mubr.bf16.vlgmr.msra.gmra.mxu1 %v1006_v43  ;;  %v4329_v56 = vpop.f32.mrf.mxu1  ;;  %v3668_v43 = vld [vmem:[#allocation8 + $0xf4] ss:$8 sps:$4 sm:$0xff]   ;;  %1796 = vmatpush1.bf16.msra.mxu0 %v3663_v40 }
 0x178   : > { %v945_v50 = vadd.bf16 %v4313_v22, %v875_v46  ;;  %v976_v52 = vmul.bf16 1009007652, %v944_v45  ;;  %1797 = vmatprep.subr.bf16.mxu0 %v3668_v43 }
 0x179   : > { %v735_v53 = vpop.f32.mrf.mxu0  ;;  %v4332_v3 = vpop.f32.mrf.mxu1 }
 0x17a   : > { %v977_v54 = vmul.bf16 1009007652, %v945_v50  ;;  %v1008_v62 = vmax.bf16 %v976_v52, %v944_v45 }
 0x17b   : > { %v737_v55 = vpop.f32.mrf.mxu0  ;;  %v4335_v11 = vpop.f32.mrf.mxu1  ;;  %1798 = vmatpush2.bf16.msra.mxu0 %v3666_v51 }
 0x17c   : > { %v876_v58 = vpack.c.bf16 %v737_v55, %v733_v47  ;;  %v1009_v59 = vmax.bf16 %v977_v54, %v945_v50 }
 0x17d   : > { %v739_v61 = vpop.f32.mrf.mxu0  ;;  %v4338_v29 = vpop.f32.mrf.mxu1 }
 0x17e   : > { %v946_v63 = vadd.bf16 %v4308_v18, %v876_v58  ;;  %v877_v1 = vpack.c.bf16 %v739_v61, %v735_v53  ;;  %1272 = vmatprep.mubr.bf16.mxu1 %v1009_v59  ;;  %v3671_v53 = vld [vmem:[#allocation8 + $0xe4] ss:$8 sps:$4 sm:$0xff]  }
 0x17f   : > { %v743_v2 = vpop.f32.mrf.mxu0  ;;  %1273 = vmatmul.mubr.bf16.gmra.mxu1 %v1008_v62  ;;  %v4341_v39 = vpop.f32.mrf.mxu1  ;;  %1799 = vmatprep.subr.bf16.mxu0 %v3671_v53 }
 0x180   : > { %v947_v4 = vadd.bf16 %v4313_v22, %v877_v1  ;;  %v978_v6 = vmul.bf16 1009007652, %v946_v63  ;;  %1800 = vmatpush2.bf16.msra.mxu0 %v3669_v60 }
 0x181   : > { %v745_v8 = vpop.f32.mrf.mxu0  ;;  %v4344_v50 = vpop.f32.mrf.mxu1 }
 0x182   : > { %v979_v9 = vmul.bf16 1009007652, %v947_v4  ;;  %v1010_v23 = vmax.bf16 %v978_v6, %v946_v63  ;;  %v3674_v63 = vld [vmem:[#allocation8 + $0xd4] ss:$8 sps:$4 sm:$0xff]  }
 0x183   : > { %v747_v10 = vpop.f32.mrf.mxu0  ;;  %v4347_v59 = vpop.f32.mrf.mxu1  ;;  %1801 = vmatprep.subr.bf16.mxu0 %v3674_v63 }
 0x184   : > { %v878_v15 = vpack.c.bf16 %v747_v10, %v743_v2  ;;  %v1011_v16 = vmax.bf16 %v979_v9, %v947_v4  ;;  %v3677_v10 = vld [vmem:[#allocation8 + $0xc4] ss:$8 sps:$4 sm:$0xff]  }
 0x185   : > { %v749_v21 = vpop.f32.mrf.mxu0  ;;  %v4350_v6 = vpop.f32.mrf.mxu1 }
 0x186   : > { %v948_v25 = vadd.bf16 %v4308_v18, %v878_v15  ;;  %v879_v26 = vpack.c.bf16 %v749_v21, %v745_v8  ;;  %1282 = vmatprep.mubr.bf16.mxu1 %v1011_v16  ;;  %v3672_v8 = vld [vmem:[#allocation8 + $0xd0] ss:$8 sps:$4 sm:$0xff]  }
 0x187   : > { %v753_v27 = vpop.f32.mrf.mxu0  ;;  %1283 = vmatmul.mubr.bf16.gmra.mxu1 %v1010_v23  ;;  %v4353_v21 = vpop.f32.mrf.mxu1  ;;  %1802 = vmatpush2.bf16.msra.mxu0 %v3672_v8  ;;  %v3675_v23 = vld [vmem:[#allocation8 + $0xc0] ss:$8 sps:$4 sm:$0xff]  }
 0x188   : > { %v949_v31 = vadd.bf16 %v4313_v22, %v879_v26  ;;  %v980_v33 = vmul.bf16 1009007652, %v948_v25  ;;  %1803 = vmatprep.subr.bf16.mxu0 %v3677_v10 }
 0x189   : > { %v755_v34 = vpop.f32.mrf.mxu0 }
 0x18a   : > { %v981_v36 = vmul.bf16 1009007652, %v949_v31  ;;  %v1012_v45 = vmax.bf16 %v980_v33, %v948_v25 }
 0x18b   : > { %v757_v37 = vpop.f32.mrf.mxu0  ;;  %1804 = vmatpush2.bf16.msra.mxu0 %v3675_v23 }
 0x18c   : > { %v880_v41 = vpack.c.bf16 %v757_v37, %v753_v27  ;;  %v1013_v42 = vmax.bf16 %v981_v36, %v949_v31  ;;  %v3680_v27 = vld [vmem:[#allocation8 + $0xb4] ss:$8 sps:$4 sm:$0xff]   ;;  %v4356_v36 = vpop.f32.mrf.mxu1  ;;  %v3678_v37 = vld [vmem:[#allocation8 + $0xb0] ss:$8 sps:$4 sm:$0xff]  }
 0x18d   : > { %v759_v44 = vpop.f32.mrf.mxu0  ;;  %1805 = vmatprep.subr.bf16.mxu0 %v3680_v27 }
 0x18e   : > { %v950_v46 = vadd.bf16 %v4308_v18, %v880_v41  ;;  %v881_v47 = vpack.c.bf16 %v759_v44, %v755_v34  ;;  %1292 = vmatprep.mubr.bf16.mxu1 %v1013_v42  ;;  %v889_v44 = vpack.c.bf16 %v4315_v24, %v4305_v17  ;;  %v888_v17 = vpack.c.bf16 %v4310_v20, %v4303_v14 }
 0x18f   : > { %v763_v49 = vpop.f32.mrf.mxu0  ;;  %1293 = vmatmul.mubr.bf16.gmra.mxu1 %v1012_v45  ;;  %1806 = vmatpush2.bf16.msra.mxu0 %v3678_v37  ;;  %v890_v14 = vpack.c.bf16 %v4323_v38, %v4318_v28  ;;  %v3683_v28 = vld [vmem:[#allocation8 + $0xa4] ss:$8 sps:$4 sm:$0xff]  }
 0x190   : > { %v951_v52 = vadd.bf16 %v4313_v22, %v881_v47  ;;  %v982_v54 = vmul.bf16 1009007652, %v950_v46  ;;  %1807 = vmatprep.subr.bf16.mxu0 %v3683_v28  ;;  %v3692_v28 = vld [vmem:[#allocation10 + $0x74] ss:$8 sps:$4 sm:$0xff]  }
 0x191   : > { %v765_v55 = vpop.f32.mrf.mxu0  ;;  %v960_v10 = vadd.bf16 %v4308_v18, %v890_v14  ;;  %2332 = vmatprep.subr.bf16.mxu1 %v3692_v28 }
 0x192   : > { %v983_v57 = vmul.bf16 1009007652, %v951_v52  ;;  %v1014_v2 = vmax.bf16 %v982_v54, %v950_v46  ;;  %v4361_v46 = vpop.f32.mrf.mxu1 }
 0x193   : > { %v767_v58 = vpop.f32.mrf.mxu0  ;;  %v992_v23 = vmul.bf16 1009007652, %v960_v10 }
 0x194   : > { %v882_v61 = vpack.c.bf16 %v767_v58, %v763_v49  ;;  %v1015_v62 = vmax.bf16 %v983_v57, %v951_v52  ;;  %v839_v57 = vpop.f32.mrf.mxu1 }
 0x195   : > { %v769_v1 = vpop.f32.mrf.mxu0 }
 0x196   : > { %v952_v0 = vadd.bf16 %v4308_v18, %v882_v61  ;;  %v883_v4 = vpack.c.bf16 %v769_v1, %v765_v55  ;;  %1302 = vmatprep.mubr.bf16.mxu1 %v1015_v62  ;;  %v959_v55 = vadd.bf16 %v4313_v22, %v889_v44  ;;  %v891_v62 = vpack.c.bf16 %v4326_v48, %v4321_v35  ;;  %v4370_v63 = vpop.f32.mrf.mxu1 }
 0x197   : > { %v773_v5 = vpop.f32.mrf.mxu0  ;;  %1303 = vmatmul.mubr.bf16.gmra.mxu1 %v1014_v2  ;;  %v958_v2 = vadd.bf16 %v4308_v18, %v888_v17  ;;  %v893_v35 = vpack.c.bf16 %v4338_v29, %v4332_v3  ;;  %v895_v3 = vpack.c.bf16 %v4350_v6, %v4344_v50  ;;  %v3689_v50 = vld [vmem:[#allocation8 + $0x84] ss:$8 sps:$4 sm:$0xff]  }
 0x198   : > { %v953_v9 = vadd.bf16 %v4313_v22, %v883_v4  ;;  %v984_v13 = vmul.bf16 1009007652, %v952_v0  ;;  %v991_v61 = vmul.bf16 1009007652, %v959_v55  ;;  %v961_v4 = vadd.bf16 %v4313_v22, %v891_v62  ;;  %v845_v8 = vpop.f32.mrf.mxu1 }
 0x199   : > { %v775_v15 = vpop.f32.mrf.mxu0 }
 0x19a   : > { %v985_v16 = vmul.bf16 1009007652, %v953_v9  ;;  %v1016_v31 = vmax.bf16 %v984_v13, %v952_v0  ;;  %v993_v20 = vmul.bf16 1009007652, %v961_v4  ;;  %v847_v48 = vpop.f32.mrf.mxu1 }
 0x19b   : > { %v777_v19 = vpop.f32.mrf.mxu0  ;;  %v898_v17 = vpack.c.bf16 %v847_v48, %v4370_v63 }
 0x19c   : > { %v884_v25 = vpack.c.bf16 %v777_v19, %v773_v5  ;;  %v1017_v26 = vmax.bf16 %v985_v16, %v953_v9  ;;  %v1023_v5 = vmax.bf16 %v991_v61, %v959_v55  ;;  %v990_v9 = vmul.bf16 1009007652, %v958_v2  ;;  %v849_v19 = vpop.f32.mrf.mxu1 }
 0x19d   : > { %v779_v30 = vpop.f32.mrf.mxu0  ;;  %v1025_v16 = vmax.bf16 %v993_v20, %v961_v4 }
 0x19e   : > { %v954_v32 = vadd.bf16 %v4308_v18, %v884_v25  ;;  %v885_v33 = vpack.c.bf16 %v779_v30, %v775_v15  ;;  %1312 = vmatprep.mubr.bf16.mxu1 %v1017_v26  ;;  %v1022_v13 = vmax.bf16 %v990_v9, %v958_v2  ;;  %v963_v15 = vadd.bf16 %v4313_v22, %v893_v35  ;;  %v3681_v26 = vld [vmem:[#allocation8 + $0xa0] ss:$8 sps:$4 sm:$0xff]   ;;  %v853_v29 = vpop.f32.mrf.mxu1 }
 0x19f   : > { %v783_v34 = vpop.f32.mrf.mxu0  ;;  %1313 = vmatmul.mubr.bf16.gmra.mxu1 %v1016_v31  ;;  %v892_v25 = vpack.c.bf16 %v4335_v11, %v4329_v56  ;;  %1808 = vmatpush2.bf16.msra.mxu0 %v3681_v26  ;;  %v1024_v30 = vmax.bf16 %v992_v23, %v960_v10  ;;  %v3686_v31 = vld [vmem:[#allocation8 + $0x94] ss:$8 sps:$4 sm:$0xff]   ;;  %v894_v11 = vpack.c.bf16 %v4347_v59, %v4341_v39  ;;  %v3690_v26 = vld [vmem:[#allocation10 + $0x70] ss:$8 sps:$4 sm:$0xff]  }
 0x1a0   : > { %v955_v40 = vadd.bf16 %v4313_v22, %v885_v33  ;;  %v986_v41 = vmul.bf16 1009007652, %v954_v32  ;;  %v995_v38 = vmul.bf16 1009007652, %v963_v15  ;;  %v855_v37 = vpop.f32.mrf.mxu1  ;;  %1809 = vmatprep.subr.bf16.mxu0 %v3686_v31  ;;  %v896_v39 = vpack.c.bf16 %v4361_v46, %v4353_v21  ;;  %2333 = vmatpush1.bf16.msra.mxu1 %v3690_v26  ;;  %v3699_v31 = vld [vmem:[#allocation10 + $0x40] ss:$8 sps:$4 sm:$0xff]  }
 0x1a1   : > { %v785_v42 = vpop.f32.mrf.mxu0  ;;  %v962_v27 = vadd.bf16 %v4308_v18, %v892_v25  ;;  %v968_v21 = vadd.bf16 %v4308_v18, %v898_v17 }
 0x1a2   : > { %v987_v43 = vmul.bf16 1009007652, %v955_v40  ;;  %v1018_v52 = vmax.bf16 %v986_v41, %v954_v32  ;;  %v965_v32 = vadd.bf16 %v4313_v22, %v895_v3  ;;  %v1027_v33 = vmax.bf16 %v995_v38, %v963_v15  ;;  %v3687_v41 = vld [vmem:[#allocation8 + $0x80] ss:$8 sps:$4 sm:$0xff]   ;;  %v3695_v38 = vld [vmem:[#allocation10 + $0x64] ss:$8 sps:$4 sm:$0xff]  }
 0x1a3   : > { %v787_v45 = vpop.f32.mrf.mxu0  ;;  %v994_v56 = vmul.bf16 1009007652, %v962_v27  ;;  %v1000_v4 = vmul.bf16 1009007652, %v968_v21  ;;  %2334 = vmatprep.subr.bf16.mxu1 %v3695_v38  ;;  %v3696_v3 = vld [vmem:[#allocation10 + $0x50] ss:$8 sps:$4 sm:$0xff]  }
 0x1a4   : > { %v886_v47 = vpack.c.bf16 %v787_v45, %v783_v34  ;;  %v1019_v49 = vmax.bf16 %v987_v43, %v955_v40  ;;  %v3684_v34 = vld [vmem:[#allocation8 + $0x90] ss:$8 sps:$4 sm:$0xff]   ;;  %v997_v6 = vmul.bf16 1009007652, %v965_v32  ;;  %v897_v40 = vpack.c.bf16 %v839_v57, %v4356_v36 }
 0x1a5   : > { %v789_v51 = vpop.f32.mrf.mxu0  ;;  %1810 = vmatpush2.bf16.msra.mxu0 %v3684_v34  ;;  %v964_v43 = vadd.bf16 %v4308_v18, %v894_v11  ;;  %v1026_v44 = vmax.bf16 %v994_v56, %v962_v27  ;;  %v1032_v20 = vmax.bf16 %v1000_v4, %v968_v21 }
 0x1a6   : > { %v956_v53 = vadd.bf16 %v4308_v18, %v886_v47  ;;  %v887_v54 = vpack.c.bf16 %v789_v51, %v785_v42  ;;  %1322 = vmatprep.mubr.bf16.mxu1 %v1019_v49  ;;  %v857_v42 = vpop.f32.mrf.mxu1  ;;  %1811 = vmatprep.subr.bf16.mxu0 %v3689_v50  ;;  %v967_v45 = vadd.bf16 %v4313_v22, %v897_v40  ;;  %v3704_v40 = vld [vmem:[#allocation10 + $0x34] ss:$8 sps:$4 sm:$0xff]  }
 0x1a7   : > { %1323 = vmatmul.mubr.bf16.gmra.mxu1 %v1018_v52  ;;  %v1029_v47 = vmax.bf16 %v997_v6, %v965_v32  ;;  %v996_v51 = vmul.bf16 1009007652, %v964_v43  ;;  %v899_v52 = vpack.c.bf16 %v849_v19, %v845_v8  ;;  %v3701_v32 = vld [vmem:[#allocation10 + $0x44] ss:$8 sps:$4 sm:$0xff]   ;;  %v3702_v6 = vld [vmem:[#allocation10 + $0x30] ss:$8 sps:$4 sm:$0xff]  }
 0x1a8   : > { %v957_v58 = vadd.bf16 %v4313_v22, %v887_v54  ;;  %v988_v60 = vmul.bf16 1009007652, %v956_v53  ;;  %v859_v49 = vpop.f32.mrf.mxu1  ;;  %v999_v59 = vmul.bf16 1009007652, %v967_v45 }
 0x1a9   : > { %1812 = vmatpush2.bf16.msra.mxu0 %v3687_v41  ;;  %v1028_v54 = vmax.bf16 %v996_v51, %v964_v43  ;;  %v969_v55 = vadd.bf16 %v4313_v22, %v899_v52  ;;  %v901_v61 = vpack.c.bf16 %v859_v49, %v855_v37  ;;  %v3705_v49 = vld [vmem:[#allocation10 + $0x20] ss:$8 sps:$4 sm:$0xff]   ;;  %v3707_v51 = vld [vmem:[#allocation10 + $0x24] ss:$8 sps:$4 sm:$0xff]  }
 0x1aa   : > { %v989_v24 = vmul.bf16 1009007652, %v957_v58  ;;  %v1020_v0 = vmax.bf16 %v988_v60, %v956_v53  ;;  %v863_v36 = vpop.f32.mrf.mxu1  ;;  %v966_v53 = vadd.bf16 %v4308_v18, %v896_v39  ;;  %v1031_v57 = vmax.bf16 %v999_v59, %v967_v45  ;;  %v3710_v59 = vld [vmem:[#allocation10 + $0x14] ss:$8 sps:$4 sm:$0xff]  }
 0x1ac   : > { %v1021_v1 = vmax.bf16 %v989_v24, %v957_v58  ;;  %v865_v58 = vpop.f32.mrf.mxu1  ;;  %v998_v60 = vmul.bf16 1009007652, %v966_v53  ;;  %v1001_v24 = vmul.bf16 1009007652, %v969_v55 }
 0x1ae   : > { %1332 = vmatprep.mubr.bf16.mxu1 %v1021_v1  ;;  %v867_v62 = vpop.f32.mrf.mxu1  ;;  %v1030_v46 = vmax.bf16 %v998_v60, %v966_v53  ;;  %v971_v1 = vadd.bf16 %v4313_v22, %v901_v61  ;;  %v1033_v2 = vmax.bf16 %v1001_v24, %v969_v55 }
 0x1af   : > { %1333 = vmatmul.mubr.bf16.gmra.mxu1 %v1020_v0  ;;  %v902_v10 = vpack.c.bf16 %v867_v62, %v863_v36  ;;  %v3711_v62 = vld [vmem:[#allocation10] ss:$8 sps:$4 sm:$0xff]  }
 0x1b0   : > { %1342 = vmatprep.mubr.bf16.mxu1 %v1023_v5  ;;  %v869_v0 = vpop.f32.mrf.mxu1  ;;  %v900_v5 = vpack.c.bf16 %v857_v42, %v853_v29  ;;  %v1003_v8 = vmul.bf16 1009007652, %v971_v1  ;;  %v3698_v29 = vld [vmem:[#allocation10 + $0x54] ss:$8 sps:$4 sm:$0xff]  }
 0x1b1   : > { %v903_v9 = vpack.c.bf16 %v869_v0, %v865_v58  ;;  %v972_v15 = vadd.bf16 %v4308_v18, %v902_v10 }
 0x1b2   : > { %v970_v14 = vadd.bf16 %v4308_v18, %v900_v5  ;;  %v1035_v35 = vmax.bf16 %v1003_v8, %v971_v1  ;;  %v3231_v18 = vld.sshfl [vmem:[%s4619_s4] sm:$0x11 pattern:$0x75316420]  ;;  %v3716_v1 = vld [vmem:[#allocation10 + $0xf4] ss:$8 sps:$4 sm:$0xff]  }
 0x1b3   : > { %v973_v63 = vadd.bf16 %v4313_v22, %v903_v9  ;;  %v1004_v23 = vmul.bf16 1009007652, %v972_v15  ;;  %v3693_v22 = vld [vmem:[#allocation10 + $0x60] ss:$8 sps:$4 sm:$0xff]   ;;  %v1464_v27 = vcombine.high %v3231_v18, %v3231_v18  ;;  %v3714_v8 = vld [vmem:[#allocation10 + $0xf0] ss:$8 sps:$4 sm:$0xff]  }
 0x1b4   : > { %v1002_v48 = vmul.bf16 1009007652, %v970_v14  ;;  %2335 = vmatpush1.bf16.msra.mxu1 %v3693_v22  ;;  %v3720_v22 = vld [vmem:[#allocation10 + $0xd0] ss:$8 sps:$4 sm:$0xff]  }
 0x1b5   : > { %v1036_v25 = vmax.bf16 %v1004_v23, %v972_v15  ;;  %2336 = vmatprep.subr.bf16.mxu1 %v3698_v29 }
 0x1b7   : > { %1343 = vmatmul.mubr.bf16.gmra.mxu1 %v1022_v13  ;;  %v1005_v13 = vmul.bf16 1009007652, %v973_v63 }
 0x1b8   : > { %1352 = vmatprep.mubr.bf16.mxu1 %v1025_v16  ;;  %v1034_v16 = vmax.bf16 %v1002_v48, %v970_v14  ;;  %2337 = vmatpush1.bf16.msra.mxu1 %v3696_v3  ;;  %v3719_v14 = vld [vmem:[#allocation10 + $0xe4] ss:$8 sps:$4 sm:$0xff]  }
 0x1b9   : > { %v1037_v19 = vmax.bf16 %v1005_v13, %v973_v63  ;;  %2338 = vmatprep.subr.bf16.mxu1 %v3701_v32  ;;  %v3717_v13 = vld [vmem:[#allocation10 + $0xe0] ss:$8 sps:$4 sm:$0xff]   ;;  %v3725_v3 = vld [vmem:[#allocation10 + $0xc4] ss:$8 sps:$4 sm:$0xff]  }
 0x1ba   : > { %v3723_v32 = vld [vmem:[#allocation10 + $0xc0] ss:$8 sps:$4 sm:$0xff]  }
 0x1bc   : > { %2339 = vmatpush1.bf16.msra.mxu1 %v3699_v31 }
 0x1bd   : > { %2340 = vmatprep.subr.bf16.mxu1 %v3704_v40 }
 0x1bf   : > { %1353 = vmatmul.mubr.bf16.gmra.mxu1 %v1024_v30  ;;  %v1471_v30 = vrot.slane %v3231_v18, %v4297_v7 }
 0x1c0   : > { %1362 = vmatprep.mubr.bf16.mxu1 %v1027_v33  ;;  %v1478_v33 = vrot.slane %v1464_v27, %v4297_v7  ;;  %2341 = vmatpush1.bf16.msra.mxu1 %v3702_v6 }
 0x1c1   : > { %v1480_v34 = vpack.i.b16 %v1471_v30, %v1471_v30  ;;  %2342 = vmatprep.subr.bf16.mxu1 %v3707_v51 }
 0x1c2   : > { %v1487_v56 = vpack.i.b16 %v1478_v33, %v1478_v33 }
 0x1c3   : > { %v4407_v50 = vrot.slane %v1480_v34, %v4301_v12 }
 0x1c4   : > { %v4410_v43 = vrot.slane %v1487_v56, %v4301_v12  ;;  %2343 = vmatpush1.bf16.msra.mxu1 %v3705_v49 }
 0x1c5   : > { %2344 = vmatprep.subr.bf16.mxu1 %v3710_v59  ;;  %v3729_v59 = vld [vmem:[#allocation10 + $0xa0] ss:$8 sps:$4 sm:$0xff]  }
 0x1c7   : > { %1363 = vmatmul.mubr.bf16.gmra.mxu1 %v1026_v44 }
 0x1c8   : > { %1372 = vmatprep.mubr.bf16.mxu1 %v1029_v47 }
 0x1cf   : > { %1373 = vmatmul.mubr.bf16.gmra.mxu1 %v1028_v54  ;;  %v3708_v54 = vld [vmem:[#allocation10 + $0x10] ss:$8 sps:$4 sm:$0xff]  }
 0x1d0   : > { %1382 = vmatprep.mubr.bf16.mxu1 %v1031_v57  ;;  %v3713_v57 = vld [vmem:[#allocation10 + $0x4] ss:$8 sps:$4 sm:$0xff]   ;;  %2345 = vmatpush1.bf16.msra.mxu1 %v3708_v54 }
 0x1d1   : > { %2346 = vmatprep.subr.bf16.mxu1 %v3713_v57 }
 0x1d4   : > { %2347 = vmatpush1.bf16.msra.mxu1 %v3711_v62 }
 0x1d5   : > { %2348 = vmatprep.subr.bf16.mxu1 %v3716_v1 }
 0x1d7   : > { %1383 = vmatmul.mubr.bf16.gmra.mxu1 %v1030_v46 }
 0x1d8   : > { %1392 = vmatprep.mubr.bf16.mxu1 %v1033_v2  ;;  %2349 = vmatpush2.bf16.msra.mxu1 %v3714_v8 }
 0x1d9   : > { %2350 = vmatprep.subr.bf16.mxu1 %v3719_v14 }
 0x1dc   : > { %2351 = vmatpush2.bf16.msra.mxu1 %v3717_v13 }
 0x1df   : > { %1393 = vmatmul.mubr.bf16.gmra.mxu1 %v1032_v20 }
 0x1e0   : > { %1402 = vmatprep.mubr.bf16.mxu1 %v1035_v35 }
 0x1e7   : > { %1403 = vmatmul.mubr.bf16.gmra.mxu1 %v1034_v16 }
 0x1e8   : > { %1412 = vmatprep.mubr.bf16.mxu1 %v1037_v19  ;;  %v3722_v19 = vld [vmem:[#allocation10 + $0xd4] ss:$8 sps:$4 sm:$0xff]  }
 0x1e9   : > { %2352 = vmatprep.subr.bf16.mxu1 %v3722_v19 }
 0x1ea   : > { %2353 = vmatpush2.bf16.msra.mxu1 %v3720_v22 }
 0x1eb   : > { %2354 = vmatprep.subr.bf16.mxu1 %v3725_v3 }
 0x1ee   : > { %2355 = vmatpush2.bf16.msra.mxu1 %v3723_v32 }
 0x1ef   : > { %1413 = vmatmul.mubr.bf16.gmra.mxu1 %v1036_v25 }
 0x237   : > { %v1264_v37 = vpop.f32.mrf.mxu1 }
 0x239   : > { %v1266_v11 = vpop.f32.mrf.mxu1 }
 0x23b   : > { %v1268_v41 = vpop.f32.mrf.mxu1 }
 0x23c   : > { %v1423_v42 = vpack.c.bf16 %v1268_v41, %v1264_v37  ;;  %v3728_v37 = vld [vmem:[#allocation10 + $0xb4] ss:$8 sps:$4 sm:$0xff]   ;;  %v3726_v41 = vld [vmem:[#allocation10 + $0xb0] ss:$8 sps:$4 sm:$0xff]  }
 0x23d   : > { %v1270_v44 = vpop.f32.mrf.mxu1  ;;  %2356 = vmatprep.subr.bf16.mxu1 %v3728_v37 }
 0x23e   : > { %v1493_v45 = vadd.bf16 %v4407_v50, %v1423_v42  ;;  %v1424_v47 = vpack.c.bf16 %v1270_v44, %v1266_v11  ;;  %v3731_v44 = vld [vmem:[#allocation10 + $0xa4] ss:$8 sps:$4 sm:$0xff]   ;;  %2357 = vmatpush2.bf16.msra.mxu1 %v3726_v41 }
 0x23f   : > { %v1274_v39 = vpop.f32.mrf.mxu1  ;;  %2358 = vmatprep.subr.bf16.mxu1 %v3731_v44 }
 0x240   : > { %v1494_v52 = vadd.bf16 %v4410_v43, %v1424_v47  ;;  %v1525_v36 = vmul.bf16 1009007652, %v1493_v45 }
 0x241   : > { %v1276_v53 = vpop.f32.mrf.mxu1 }
 0x242   : > { %v1526_v55 = vmul.bf16 1009007652, %v1494_v52  ;;  %v1557_v24 = vmax.bf16 %v1525_v36, %v1493_v45  ;;  %2359 = vmatpush2.bf16.msra.mxu1 %v3729_v59 }
 0x243   : > { %v1278_v58 = vpop.f32.mrf.mxu1 }
 0x244   : > { %v1425_v60 = vpack.c.bf16 %v1278_v58, %v1274_v39  ;;  %v1558_v17 = vmax.bf16 %v1526_v55, %v1494_v52 }
 0x245   : > { %v1280_v61 = vpop.f32.mrf.mxu1 }
 0x246   : > { %v1495_v21 = vadd.bf16 %v4407_v50, %v1425_v60  ;;  %v1426_v46 = vpack.c.bf16 %v1280_v61, %v1276_v53  ;;  %1813 = vmatprep.mubr.bf16.mxu0 %v1558_v17  ;;  %v3734_v53 = vld [vmem:[#allocation10 + $0x94] ss:$8 sps:$4 sm:$0xff]   ;;  %v3732_v60 = vld [vmem:[#allocation10 + $0x90] ss:$8 sps:$4 sm:$0xff]  }
 0x247   : > { %v1284_v2 = vpop.f32.mrf.mxu1  ;;  %1814 = vmatmul.mubr.bf16.vlgmr.msra.gmra.mxu0 %v1557_v24  ;;  %2360 = vmatprep.subr.bf16.mxu1 %v3734_v53 }
 0x248   : > { %v1496_v0 = vadd.bf16 %v4410_v43, %v1426_v46  ;;  %v1527_v4 = vmul.bf16 1009007652, %v1495_v21  ;;  %2361 = vmatpush2.bf16.msra.mxu1 %v3732_v60 }
 0x249   : > { %v1286_v5 = vpop.f32.mrf.mxu1 }
 0x24a   : > { %v1528_v9 = vmul.bf16 1009007652, %v1496_v0  ;;  %v1559_v10 = vmax.bf16 %v1527_v4, %v1495_v21 }
 0x24b   : > { %v1288_v20 = vpop.f32.mrf.mxu1 }
 0x24c   : > { %v1427_v63 = vpack.c.bf16 %v1288_v20, %v1284_v2  ;;  %v1560_v35 = vmax.bf16 %v1528_v9, %v1496_v0 }
 0x24d   : > { %v1290_v48 = vpop.f32.mrf.mxu1 }
 0x24e   : > { %v1497_v15 = vadd.bf16 %v4407_v50, %v1427_v63  ;;  %v1428_v16 = vpack.c.bf16 %v1290_v48, %v1286_v5  ;;  %1823 = vmatprep.mubr.bf16.mxu0 %v1560_v35 }
 0x24f   : > { %v1294_v23 = vpop.f32.mrf.mxu1  ;;  %1824 = vmatmul.mubr.bf16.gmra.mxu0 %v1559_v10 }
 0x250   : > { %v1498_v25 = vadd.bf16 %v4410_v43, %v1428_v16  ;;  %v1529_v26 = vmul.bf16 1009007652, %v1497_v15 }
 0x251   : > { %v1296_v28 = vpop.f32.mrf.mxu1 }
 0x252   : > { %v1530_v38 = vmul.bf16 1009007652, %v1498_v25  ;;  %v1561_v31 = vmax.bf16 %v1529_v26, %v1497_v15 }
 0x253   : > { %v1298_v29 = vpop.f32.mrf.mxu1 }
 0x254   : > { %v1429_v18 = vpack.c.bf16 %v1298_v29, %v1294_v23  ;;  %v1562_v27 = vmax.bf16 %v1530_v38, %v1498_v25 }
 0x255   : > { %v1300_v30 = vpop.f32.mrf.mxu1 }
 0x256   : > { %v1499_v33 = vadd.bf16 %v4407_v50, %v1429_v18  ;;  %v1430_v34 = vpack.c.bf16 %v1300_v30, %v1296_v28  ;;  %1833 = vmatprep.mubr.bf16.mxu0 %v1562_v27 }
 0x257   : > { %v1304_v56 = vpop.f32.mrf.mxu1  ;;  %1834 = vmatmul.mubr.bf16.gmra.mxu0 %v1561_v31 }
 0x258   : > { %v1500_v11 = vadd.bf16 %v4410_v43, %v1430_v34  ;;  %v1531_v6 = vmul.bf16 1009007652, %v1499_v33 }
 0x259   : > { %v1306_v40 = vpop.f32.mrf.mxu1 }
 0x25a   : > { %v1532_v42 = vmul.bf16 1009007652, %v1500_v11  ;;  %v1563_v39 = vmax.bf16 %v1531_v6, %v1499_v33 }
 0x25b   : > { %v1308_v45 = vpop.f32.mrf.mxu1 }
 0x25c   : > { %v1431_v47 = vpack.c.bf16 %v1308_v45, %v1304_v56  ;;  %v1564_v49 = vmax.bf16 %v1532_v42, %v1500_v11 }
 0x25d   : > { %v1310_v51 = vpop.f32.mrf.mxu1 }
 0x25e   : > { %v1501_v52 = vadd.bf16 %v4407_v50, %v1431_v47  ;;  %v1432_v36 = vpack.c.bf16 %v1310_v51, %v1306_v40  ;;  %1843 = vmatprep.mubr.bf16.mxu0 %v1564_v49 }
 0x25f   : > { %v1314_v54 = vpop.f32.mrf.mxu1  ;;  %1844 = vmatmul.mubr.bf16.gmra.mxu0 %v1563_v39 }
 0x260   : > { %v1502_v55 = vadd.bf16 %v4410_v43, %v1432_v36  ;;  %v1533_v57 = vmul.bf16 1009007652, %v1501_v52 }
 0x261   : > { %v1316_v58 = vpop.f32.mrf.mxu1 }
 0x262   : > { %v1534_v17 = vmul.bf16 1009007652, %v1502_v55  ;;  %v1565_v46 = vmax.bf16 %v1533_v57, %v1501_v52 }
 0x263   : > { %v1318_v24 = vpop.f32.mrf.mxu1 }
 0x264   : > { %v1433_v61 = vpack.c.bf16 %v1318_v24, %v1314_v54  ;;  %v1566_v62 = vmax.bf16 %v1534_v17, %v1502_v55 }
 0x265   : > { %v1320_v21 = vpop.f32.mrf.mxu1 }
 0x266   : > { %v1503_v1 = vadd.bf16 %v4407_v50, %v1433_v61  ;;  %v1434_v2 = vpack.c.bf16 %v1320_v21, %v1316_v58  ;;  %1853 = vmatprep.mubr.bf16.mxu0 %v1566_v62 }
 0x267   : > { %v1324_v0 = vpop.f32.mrf.mxu1  ;;  %1854 = vmatmul.mubr.bf16.gmra.mxu0 %v1565_v46 }
 0x268   : > { %v1504_v4 = vadd.bf16 %v4410_v43, %v1434_v2  ;;  %v1535_v5 = vmul.bf16 1009007652, %v1503_v1 }
 0x269   : > { %v1326_v8 = vpop.f32.mrf.mxu1 }
 0x26a   : > { %v1536_v9 = vmul.bf16 1009007652, %v1504_v4  ;;  %v1567_v48 = vmax.bf16 %v1535_v5, %v1503_v1 }
 0x26b   : > { %v1328_v14 = vpop.f32.mrf.mxu1 }
 0x26c   : > { %v1435_v20 = vpack.c.bf16 %v1328_v14, %v1324_v0  ;;  %v1568_v63 = vmax.bf16 %v1536_v9, %v1504_v4  ;;  %v3737_v9 = vld [vmem:[#allocation10 + $0x84] ss:$8 sps:$4 sm:$0xff]  }
 0x26d   : > { %v1330_v35 = vpop.f32.mrf.mxu1  ;;  %2362 = vmatprep.subr.bf16.mxu1 %v3737_v9 }
 0x26e   : > { %v1505_v10 = vadd.bf16 %v4407_v50, %v1435_v20  ;;  %v1436_v13 = vpack.c.bf16 %v1330_v35, %v1326_v8  ;;  %1863 = vmatprep.mubr.bf16.mxu0 %v1568_v63  ;;  %v3735_v20 = vld [vmem:[#allocation10 + $0x80] ss:$8 sps:$4 sm:$0xff]  }
 0x26f   : > { %v1334_v15 = vpop.f32.mrf.mxu1  ;;  %1864 = vmatmul.mubr.bf16.gmra.mxu0 %v1567_v48  ;;  %2363 = vmatpush2.bf16.msra.mxu1 %v3735_v20 }
 0x270   : > { %v1506_v16 = vadd.bf16 %v4410_v43, %v1436_v13  ;;  %v1537_v19 = vmul.bf16 1009007652, %v1505_v10 }
 0x271   : > { %v1336_v23 = vpop.f32.mrf.mxu1 }
 0x272   : > { %v1538_v25 = vmul.bf16 1009007652, %v1506_v16  ;;  %v1569_v3 = vmax.bf16 %v1537_v19, %v1505_v10 }
 0x273   : > { %v1338_v26 = vpop.f32.mrf.mxu1 }
 0x274   : > { %v1437_v28 = vpack.c.bf16 %v1338_v26, %v1334_v15  ;;  %v1570_v22 = vmax.bf16 %v1538_v25, %v1506_v16 }
 0x275   : > { %v1340_v38 = vpop.f32.mrf.mxu1 }
 0x276   : > { %v1507_v29 = vadd.bf16 %v4407_v50, %v1437_v28  ;;  %v1438_v18 = vpack.c.bf16 %v1340_v38, %v1336_v23  ;;  %1873 = vmatprep.mubr.bf16.mxu0 %v1570_v22 }
 0x277   : > { %v1344_v27 = vpop.f32.mrf.mxu1  ;;  %1874 = vmatmul.mubr.bf16.gmra.mxu0 %v1569_v3 }
 0x278   : > { %v1508_v30 = vadd.bf16 %v4410_v43, %v1438_v18  ;;  %v1539_v31 = vmul.bf16 1009007652, %v1507_v29 }
 0x279   : > { %v1346_v32 = vpop.f32.mrf.mxu1 }
 0x27a   : > { %v1540_v33 = vmul.bf16 1009007652, %v1508_v30  ;;  %v1571_v6 = vmax.bf16 %v1539_v31, %v1507_v29 }
 0x27b   : > { %v1348_v34 = vpop.f32.mrf.mxu1 }
 0x27c   : > { %v1439_v37 = vpack.c.bf16 %v1348_v34, %v1344_v27  ;;  %v1572_v56 = vmax.bf16 %v1540_v33, %v1508_v30 }
 0x27d   : > { %v1350_v11 = vpop.f32.mrf.mxu1 }
 0x27e   : > { %v1509_v40 = vadd.bf16 %v4407_v50, %v1439_v37  ;;  %v1440_v41 = vpack.c.bf16 %v1350_v11, %v1346_v32  ;;  %1883 = vmatprep.mubr.bf16.mxu0 %v1572_v56 }
 0x27f   : > { %v1354_v42 = vpop.f32.mrf.mxu1  ;;  %1884 = vmatmul.mubr.bf16.gmra.mxu0 %v1571_v6 }
 0x280   : > { %v1510_v44 = vadd.bf16 %v4410_v43, %v1440_v41  ;;  %v1541_v45 = vmul.bf16 1009007652, %v1509_v40 }
 0x281   : > { %v1356_v47 = vpop.f32.mrf.mxu1 }
 0x282   : > { %v1542_v49 = vmul.bf16 1009007652, %v1510_v44  ;;  %v1573_v36 = vmax.bf16 %v1541_v45, %v1509_v40 }
 0x283   : > { %v1358_v51 = vpop.f32.mrf.mxu1 }
 0x284   : > { %v1441_v39 = vpack.c.bf16 %v1358_v51, %v1354_v42  ;;  %v1574_v59 = vmax.bf16 %v1542_v49, %v1510_v44 }
 0x285   : > { %v1360_v52 = vpop.f32.mrf.mxu1 }
 0x286   : > { %v1511_v53 = vadd.bf16 %v4407_v50, %v1441_v39  ;;  %v1442_v54 = vpack.c.bf16 %v1360_v52, %v1356_v47  ;;  %1893 = vmatprep.mubr.bf16.mxu0 %v1574_v59 }
 0x287   : > { %v1364_v55 = vpop.f32.mrf.mxu1  ;;  %1894 = vmatmul.mubr.bf16.gmra.mxu0 %v1573_v36 }
 0x288   : > { %v1512_v57 = vadd.bf16 %v4410_v43, %v1442_v54  ;;  %v1543_v58 = vmul.bf16 1009007652, %v1511_v53 }
 0x289   : > { %v1366_v60 = vpop.f32.mrf.mxu1 }
 0x28a   : > { %v1544_v17 = vmul.bf16 1009007652, %v1512_v57  ;;  %v1575_v46 = vmax.bf16 %v1543_v58, %v1511_v53 }
 0x28b   : > { %v1368_v24 = vpop.f32.mrf.mxu1 }
 0x28c   : > { %v1443_v61 = vpack.c.bf16 %v1368_v24, %v1364_v55  ;;  %v1576_v62 = vmax.bf16 %v1544_v17, %v1512_v57 }
 0x28d   : > { %v1370_v21 = vpop.f32.mrf.mxu1 }
 0x28e   : > { %v1513_v1 = vadd.bf16 %v4407_v50, %v1443_v61  ;;  %v1444_v2 = vpack.c.bf16 %v1370_v21, %v1366_v60  ;;  %1903 = vmatprep.mubr.bf16.mxu0 %v1576_v62 }
 0x28f   : > { %v1374_v0 = vpop.f32.mrf.mxu1  ;;  %1904 = vmatmul.mubr.bf16.gmra.mxu0 %v1575_v46 }
 0x290   : > { %v1514_v4 = vadd.bf16 %v4410_v43, %v1444_v2  ;;  %v1545_v5 = vmul.bf16 1009007652, %v1513_v1 }
 0x291   : > { %v1376_v8 = vpop.f32.mrf.mxu1 }
 0x292   : > { %v1546_v14 = vmul.bf16 1009007652, %v1514_v4  ;;  %v1577_v13 = vmax.bf16 %v1545_v5, %v1513_v1 }
 0x293   : > { %v1378_v63 = vpop.f32.mrf.mxu1 }
 0x294   : > { %v1445_v35 = vpack.c.bf16 %v1378_v63, %v1374_v0  ;;  %v1578_v48 = vmax.bf16 %v1546_v14, %v1514_v4  ;;  %v3738_v63 = vld [vmem:[#allocation11 + $0x78] sm:$0xff]  }
 0x295   : > { %v1380_v10 = vpop.f32.mrf.mxu1  ;;  %3321 = vmatprep.subr.bf16.mxu0 %v3738_v63 }
 0x296   : > { %v1515_v15 = vadd.bf16 %v4407_v50, %v1445_v35  ;;  %v1446_v16 = vpack.c.bf16 %v1380_v10, %v1376_v8  ;;  %1913 = vmatprep.mubr.bf16.mxu0 %v1578_v48  ;;  %v3739_v35 = vld [vmem:[#allocation11 + $0x38] sm:$0xff]   ;;  %v3740_v48 = vld [vmem:[#allocation11 + $0x70] sm:$0xff]  }
 0x297   : > { %v1384_v19 = vpop.f32.mrf.mxu1  ;;  %1914 = vmatmul.mubr.bf16.gmra.mxu0 %v1577_v13  ;;  %v3741_v10 = vld [vmem:[#allocation11 + $0x30] sm:$0xff]  }
 0x298   : > { %v1516_v23 = vadd.bf16 %v4410_v43, %v1446_v16  ;;  %v1547_v25 = vmul.bf16 1009007652, %v1515_v15  ;;  %3322 = vmatpush3.bf16.msra.mxu0 %v3739_v35 }
 0x299   : > { %v1386_v26 = vpop.f32.mrf.mxu1  ;;  %3323 = vmatprep.subr.bf16.mxu0 %v3740_v48 }
 0x29a   : > { %v1548_v28 = vmul.bf16 1009007652, %v1516_v23  ;;  %v1579_v18 = vmax.bf16 %v1547_v25, %v1515_v15 }
 0x29b   : > { %v1388_v22 = vpop.f32.mrf.mxu1 }
 0x29c   : > { %v1447_v38 = vpack.c.bf16 %v1388_v22, %v1384_v19  ;;  %v1580_v3 = vmax.bf16 %v1548_v28, %v1516_v23  ;;  %3324 = vmatpush3.bf16.msra.mxu0 %v3741_v10  ;;  %v3742_v28 = vld [vmem:[#allocation11 + $0x68] sm:$0xff]  }
 0x29d   : > { %v1390_v29 = vpop.f32.mrf.mxu1  ;;  %v3743_v22 = vld [vmem:[#allocation11 + $0x28] sm:$0xff]   ;;  %3325 = vmatprep.subr.bf16.mxu0 %v3742_v28 }
 0x29e   : > { %v1517_v27 = vadd.bf16 %v4407_v50, %v1447_v38  ;;  %v1448_v30 = vpack.c.bf16 %v1390_v29, %v1386_v26  ;;  %1923 = vmatprep.mubr.bf16.mxu0 %v1580_v3 }
 0x29f   : > { %v1394_v31 = vpop.f32.mrf.mxu1  ;;  %1924 = vmatmul.mubr.bf16.gmra.mxu0 %v1579_v18 }
 0x2a0   : > { %v1518_v32 = vadd.bf16 %v4410_v43, %v1448_v30  ;;  %v1549_v33 = vmul.bf16 1009007652, %v1517_v27  ;;  %3326 = vmatpush3.bf16.msra.mxu0 %v3743_v22 }
 0x2a1   : > { %v1396_v34 = vpop.f32.mrf.mxu1 }
 0x2a2   : > { %v1550_v37 = vmul.bf16 1009007652, %v1518_v32  ;;  %v1581_v41 = vmax.bf16 %v1549_v33, %v1517_v27  ;;  %v3745_v33 = vld [vmem:[#allocation11 + $0x20] sm:$0xff]  }
 0x2a3   : > { %v1398_v56 = vpop.f32.mrf.mxu1 }
 0x2a4   : > { %v1449_v11 = vpack.c.bf16 %v1398_v56, %v1394_v31  ;;  %v1582_v6 = vmax.bf16 %v1550_v37, %v1518_v32  ;;  %v3744_v32 = vld [vmem:[#allocation11 + $0x60] sm:$0xff]  }
 0x2a5   : > { %v1400_v40 = vpop.f32.mrf.mxu1  ;;  %3327 = vmatprep.subr.bf16.mxu0 %v3744_v32 }
 0x2a6   : > { %v1519_v42 = vadd.bf16 %v4407_v50, %v1449_v11  ;;  %v1450_v44 = vpack.c.bf16 %v1400_v40, %v1396_v34  ;;  %1933 = vmatprep.mubr.bf16.mxu0 %v1582_v6  ;;  %v3746_v34 = vld [vmem:[#allocation11 + $0x58] sm:$0xff]   ;;  %3328 = vmatpush3.bf16.msra.mxu0 %v3745_v33 }
 0x2a7   : > { %v1404_v45 = vpop.f32.mrf.mxu1  ;;  %1934 = vmatmul.mubr.bf16.gmra.mxu0 %v1581_v41  ;;  %v3747_v40 = vld [vmem:[#allocation11 + $0x18] sm:$0xff]   ;;  %3329 = vmatprep.subr.bf16.mxu0 %v3746_v34 }
 0x2a8   : > { %v1520_v47 = vadd.bf16 %v4410_v43, %v1450_v44  ;;  %v1551_v49 = vmul.bf16 1009007652, %v1519_v42 }
 0x2a9   : > { %v1406_v51 = vpop.f32.mrf.mxu1 }
 0x2aa   : > { %v1552_v39 = vmul.bf16 1009007652, %v1520_v47  ;;  %v1583_v54 = vmax.bf16 %v1551_v49, %v1519_v42  ;;  %v3748_v42 = vld [vmem:[#allocation11 + $0x50] sm:$0xff]   ;;  %3330 = vmatpush3.bf16.msra.mxu0 %v3747_v40 }
 0x2ab   : > { %v1408_v59 = vpop.f32.mrf.mxu1  ;;  %3331 = vmatprep.subr.bf16.mxu0 %v3748_v42 }
 0x2ac   : > { %v1451_v52 = vpack.c.bf16 %v1408_v59, %v1404_v45  ;;  %v1584_v36 = vmax.bf16 %v1552_v39, %v1520_v47  ;;  %v3749_v59 = vld [vmem:[#allocation11 + $0x10] sm:$0xff]  }
 0x2ad   : > { %v1410_v53 = vpop.f32.mrf.mxu1 }
 0x2ae   : > { %v1521_v55 = vadd.bf16 %v4407_v50, %v1451_v52  ;;  %v1452_v57 = vpack.c.bf16 %v1410_v53, %v1406_v51  ;;  %1943 = vmatprep.mubr.bf16.mxu0 %v1584_v36  ;;  %v3750_v36 = vld [vmem:[#allocation11 + $0x48] sm:$0xff]   ;;  %3332 = vmatpush3.bf16.msra.mxu0 %v3749_v59 }
 0x2af   : > { %v1414_v58 = vpop.f32.mrf.mxu1  ;;  %1944 = vmatmul.mubr.bf16.gmra.mxu0 %v1583_v54  ;;  %3333 = vmatprep.subr.bf16.mxu0 %v3750_v36 }
 0x2b0   : > { %v1522_v60 = vadd.bf16 %v4410_v43, %v1452_v57  ;;  %v1553_v17 = vmul.bf16 1009007652, %v1521_v55 }
 0x2b1   : > { %v1416_v24 = vpop.f32.mrf.mxu1 }
 0x2b2   : > { %v1554_v61 = vmul.bf16 1009007652, %v1522_v60  ;;  %v1585_v2 = vmax.bf16 %v1553_v17, %v1521_v55  ;;  %v3752_v17 = vld [vmem:[#allocation11 + $0x40] sm:$0xff]  }
 0x2b3   : > { %v1418_v62 = vpop.f32.mrf.mxu1 }
 0x2b4   : > { %v1453_v21 = vpack.c.bf16 %v1418_v62, %v1414_v58  ;;  %v1586_v46 = vmax.bf16 %v1554_v61, %v1522_v60  ;;  %v3751_v58 = vld [vmem:[#allocation11 + $0x8] sm:$0xff]  }
 0x2b5   : > { %v1420_v1 = vpop.f32.mrf.mxu1  ;;  %3334 = vmatpush3.bf16.msra.mxu0 %v3751_v58 }
 0x2b6   : > { %v1523_v0 = vadd.bf16 %v4407_v50, %v1453_v21  ;;  %v1454_v4 = vpack.c.bf16 %v1420_v1, %v1416_v24  ;;  %1953 = vmatprep.mubr.bf16.mxu0 %v1586_v46  ;;  %v3264_v50 = vld.sshfl [vmem:[%s4621_s6] sm:$0x11 pattern:$0x75316420]  ;;  %3335 = vmatprep.subr.bf16.mxu0 %v3752_v17 }
 0x2b7   : > { %1954 = vmatmul.mubr.bf16.gmra.mxu0 %v1585_v2  ;;  %v2015_v13 = vcombine.high %v3264_v50, %v3264_v50 }
 0x2b8   : > { %v1524_v5 = vadd.bf16 %v4410_v43, %v1454_v4  ;;  %v1555_v8 = vmul.bf16 1009007652, %v1523_v0  ;;  %v2022_v43 = vrot.slane %v3264_v50, %v4297_v7 }
 0x2b9   : > { %v2029_v15 = vrot.slane %v2015_v13, %v4297_v7 }
 0x2ba   : > { %v1556_v9 = vmul.bf16 1009007652, %v1524_v5  ;;  %v1587_v20 = vmax.bf16 %v1555_v8, %v1523_v0  ;;  %v2031_v16 = vpack.i.b16 %v2022_v43, %v2022_v43 }
 0x2bb   : > { %v2038_v23 = vpack.i.b16 %v2029_v15, %v2029_v15 }
 0x2bc   : > { %v1588_v14 = vmax.bf16 %v1556_v9, %v1524_v5  ;;  %v4450_v26 = vrot.slane %v2031_v16, %v4301_v12 }
 0x2bd   : > { %v4453_v29 = vrot.slane %v2038_v23, %v4301_v12 }
 0x2be   : > { %1963 = vmatprep.mubr.bf16.mxu0 %v1588_v14 }
 0x2bf   : > { %1964 = vmatmul.mubr.bf16.gmra.mxu0 %v1587_v20 }
 0x307   : > { %v1815_v19 = vpop.f32.mrf.mxu0 }
 0x309   : > { %v1817_v25 = vpop.f32.mrf.mxu0 }
 0x30b   : > { %v1819_v38 = vpop.f32.mrf.mxu0 }
 0x30c   : > { %v1974_v3 = vpack.c.bf16 %v1819_v38, %v1815_v19 }
 0x30d   : > { %v1821_v18 = vpop.f32.mrf.mxu0 }
 0x30e   : > { %v2044_v27 = vadd.bf16 %v4450_v26, %v1974_v3  ;;  %v1975_v30 = vpack.c.bf16 %v1821_v18, %v1817_v25 }
 0x30f   : > { %v1825_v31 = vpop.f32.mrf.mxu0 }
 0x310   : > { %v2045_v37 = vadd.bf16 %v4453_v29, %v1975_v30  ;;  %v2076_v56 = vmul.bf16 1009007652, %v2044_v27 }
 0x311   : > { %v1827_v11 = vpop.f32.mrf.mxu0 }
 0x312   : > { %v2077_v6 = vmul.bf16 1009007652, %v2045_v37  ;;  %v2108_v47 = vmax.bf16 %v2076_v56, %v2044_v27 }
 0x313   : > { %v1829_v41 = vpop.f32.mrf.mxu0 }
 0x314   : > { %v1976_v44 = vpack.c.bf16 %v1829_v41, %v1825_v31  ;;  %v2109_v45 = vmax.bf16 %v2077_v6, %v2045_v37 }
 0x315   : > { %v1831_v49 = vpop.f32.mrf.mxu0 }
 0x316   : > { %v2046_v51 = vadd.bf16 %v4450_v26, %v1976_v44  ;;  %v1977_v39 = vpack.c.bf16 %v1831_v49, %v1827_v11  ;;  %2364 = vmatprep.mubr.bf16.mxu1 %v2109_v45 }
 0x317   : > { %v1835_v52 = vpop.f32.mrf.mxu0  ;;  %2365 = vmatmul.mubr.bf16.vlgmr.msra.gmra.mxu1 %v2108_v47 }
 0x318   : > { %v2047_v53 = vadd.bf16 %v4453_v29, %v1977_v39  ;;  %v2078_v54 = vmul.bf16 1009007652, %v2046_v51 }
 0x319   : > { %v1837_v55 = vpop.f32.mrf.mxu0 }
 0x31a   : > { %v2079_v57 = vmul.bf16 1009007652, %v2047_v53  ;;  %v2110_v21 = vmax.bf16 %v2078_v54, %v2046_v51 }
 0x31b   : > { %v1839_v60 = vpop.f32.mrf.mxu0 }
 0x31c   : > { %v1978_v24 = vpack.c.bf16 %v1839_v60, %v1835_v52  ;;  %v2111_v61 = vmax.bf16 %v2079_v57, %v2047_v53 }
 0x31d   : > { %v1841_v62 = vpop.f32.mrf.mxu0 }
 0x31e   : > { %v2048_v46 = vadd.bf16 %v4450_v26, %v1978_v24  ;;  %v1979_v1 = vpack.c.bf16 %v1841_v62, %v1837_v55  ;;  %2374 = vmatprep.mubr.bf16.mxu1 %v2111_v61 }
 0x31f   : > { %v1845_v2 = vpop.f32.mrf.mxu0  ;;  %2375 = vmatmul.mubr.bf16.gmra.mxu1 %v2110_v21 }
 0x320   : > { %v2049_v0 = vadd.bf16 %v4453_v29, %v1979_v1  ;;  %v2080_v4 = vmul.bf16 1009007652, %v2048_v46 }
 0x321   : > { %v1847_v5 = vpop.f32.mrf.mxu0 }
 0x322   : > { %v2081_v8 = vmul.bf16 1009007652, %v2049_v0  ;;  %v2112_v35 = vmax.bf16 %v2080_v4, %v2048_v46 }
 0x323   : > { %v1849_v9 = vpop.f32.mrf.mxu0 }
 0x324   : > { %v1980_v14 = vpack.c.bf16 %v1849_v9, %v1845_v2  ;;  %v2113_v20 = vmax.bf16 %v2081_v8, %v2049_v0 }
 0x325   : > { %v1851_v63 = vpop.f32.mrf.mxu0 }
 0x326   : > { %v2050_v48 = vadd.bf16 %v4450_v26, %v1980_v14  ;;  %v1981_v10 = vpack.c.bf16 %v1851_v63, %v1847_v5  ;;  %2384 = vmatprep.mubr.bf16.mxu1 %v2113_v20 }
 0x327   : > { %v1855_v50 = vpop.f32.mrf.mxu0  ;;  %2385 = vmatmul.mubr.bf16.gmra.mxu1 %v2112_v35 }
 0x328   : > { %v2051_v13 = vadd.bf16 %v4453_v29, %v1981_v10  ;;  %v2082_v43 = vmul.bf16 1009007652, %v2050_v48 }
 0x329   : > { %v1857_v15 = vpop.f32.mrf.mxu0 }
 0x32a   : > { %v2083_v16 = vmul.bf16 1009007652, %v2051_v13  ;;  %v2114_v22 = vmax.bf16 %v2082_v43, %v2050_v48 }
 0x32b   : > { %v1859_v19 = vpop.f32.mrf.mxu0 }
 0x32c   : > { %v1982_v23 = vpack.c.bf16 %v1859_v19, %v1855_v50  ;;  %v2115_v25 = vmax.bf16 %v2083_v16, %v2051_v13 }
 0x32d   : > { %v1861_v28 = vpop.f32.mrf.mxu0 }
 0x32e   : > { %v2052_v38 = vadd.bf16 %v4450_v26, %v1982_v23  ;;  %v1983_v3 = vpack.c.bf16 %v1861_v28, %v1857_v15  ;;  %2394 = vmatprep.mubr.bf16.mxu1 %v2115_v25 }
 0x32f   : > { %v1865_v18 = vpop.f32.mrf.mxu0  ;;  %2395 = vmatmul.mubr.bf16.gmra.mxu1 %v2114_v22 }
 0x330   : > { %v2053_v27 = vadd.bf16 %v4453_v29, %v1983_v3  ;;  %v2084_v30 = vmul.bf16 1009007652, %v2052_v38 }
 0x331   : > { %v1867_v31 = vpop.f32.mrf.mxu0 }
 0x332   : > { %v2085_v32 = vmul.bf16 1009007652, %v2053_v27  ;;  %v2116_v56 = vmax.bf16 %v2084_v30, %v2052_v38 }
 0x333   : > { %v1869_v33 = vpop.f32.mrf.mxu0 }
 0x334   : > { %v1984_v34 = vpack.c.bf16 %v1869_v33, %v1865_v18  ;;  %v2117_v37 = vmax.bf16 %v2085_v32, %v2053_v27  ;;  %v3753_v27 = vld [vmem:[#allocation11] sm:$0xff]  }
 0x335   : > { %v1871_v11 = vpop.f32.mrf.mxu0  ;;  %3336 = vmatpush3.bf16.msra.mxu0 %v3753_v27 }
 0x336   : > { %v2054_v6 = vadd.bf16 %v4450_v26, %v1984_v34  ;;  %v1985_v40 = vpack.c.bf16 %v1871_v11, %v1867_v31  ;;  %2404 = vmatprep.mubr.bf16.mxu1 %v2117_v37 }
 0x337   : > { %v1875_v41 = vpop.f32.mrf.mxu0  ;;  %2405 = vmatmul.mubr.bf16.gmra.mxu1 %v2116_v56 }
 0x338   : > { %v2055_v42 = vadd.bf16 %v4453_v29, %v1985_v40  ;;  %v2086_v44 = vmul.bf16 1009007652, %v2054_v6 }
 0x339   : > { %v1877_v45 = vpop.f32.mrf.mxu0 }
 0x33a   : > { %v2087_v47 = vmul.bf16 1009007652, %v2055_v42  ;;  %v2118_v59 = vmax.bf16 %v2086_v44, %v2054_v6 }
 0x33b   : > { %v1879_v49 = vpop.f32.mrf.mxu0 }
 0x33c   : > { %v1986_v51 = vpack.c.bf16 %v1879_v49, %v1875_v41  ;;  %v2119_v39 = vmax.bf16 %v2087_v47, %v2055_v42 }
 0x33d   : > { %v1881_v52 = vpop.f32.mrf.mxu0 }
 0x33e   : > { %v2056_v36 = vadd.bf16 %v4450_v26, %v1986_v51  ;;  %v1987_v53 = vpack.c.bf16 %v1881_v52, %v1877_v45  ;;  %2414 = vmatprep.mubr.bf16.mxu1 %v2119_v39 }
 0x33f   : > { %v1885_v54 = vpop.f32.mrf.mxu0  ;;  %2415 = vmatmul.mubr.bf16.gmra.mxu1 %v2118_v59 }
 0x340   : > { %v2057_v55 = vadd.bf16 %v4453_v29, %v1987_v53  ;;  %v2088_v57 = vmul.bf16 1009007652, %v2056_v36 }
 0x341   : > { %v1887_v58 = vpop.f32.mrf.mxu0 }
 0x342   : > { %v2089_v60 = vmul.bf16 1009007652, %v2057_v55  ;;  %v2120_v62 = vmax.bf16 %v2088_v57, %v2056_v36 }
 0x343   : > { %v1889_v17 = vpop.f32.mrf.mxu0 }
 0x344   : > { %v1988_v24 = vpack.c.bf16 %v1889_v17, %v1885_v54  ;;  %v2121_v61 = vmax.bf16 %v2089_v60, %v2057_v55 }
 0x345   : > { %v1891_v21 = vpop.f32.mrf.mxu0 }
 0x346   : > { %v2058_v46 = vadd.bf16 %v4450_v26, %v1988_v24  ;;  %v1989_v1 = vpack.c.bf16 %v1891_v21, %v1887_v58  ;;  %2424 = vmatprep.mubr.bf16.mxu1 %v2121_v61 }
 0x347   : > { %v1895_v2 = vpop.f32.mrf.mxu0  ;;  %2425 = vmatmul.mubr.bf16.gmra.mxu1 %v2120_v62 }
 0x348   : > { %v2059_v0 = vadd.bf16 %v4453_v29, %v1989_v1  ;;  %v2090_v4 = vmul.bf16 1009007652, %v2058_v46 }
 0x349   : > { %v1897_v5 = vpop.f32.mrf.mxu0 }
 0x34a   : > { %v2091_v8 = vmul.bf16 1009007652, %v2059_v0  ;;  %v2122_v63 = vmax.bf16 %v2090_v4, %v2058_v46 }
 0x34b   : > { %v1899_v9 = vpop.f32.mrf.mxu0 }
 0x34c   : > { %v1990_v14 = vpack.c.bf16 %v1899_v9, %v1895_v2  ;;  %v2123_v20 = vmax.bf16 %v2091_v8, %v2059_v0 }
 0x34d   : > { %v1901_v35 = vpop.f32.mrf.mxu0 }
 0x34e   : > { %v2060_v48 = vadd.bf16 %v4450_v26, %v1990_v14  ;;  %v1991_v10 = vpack.c.bf16 %v1901_v35, %v1897_v5  ;;  %2434 = vmatprep.mubr.bf16.mxu1 %v2123_v20 }
 0x34f   : > { %v1905_v50 = vpop.f32.mrf.mxu0  ;;  %2435 = vmatmul.mubr.bf16.gmra.mxu1 %v2122_v63 }
 0x350   : > { %v2061_v13 = vadd.bf16 %v4453_v29, %v1991_v10  ;;  %v2092_v43 = vmul.bf16 1009007652, %v2060_v48 }
 0x351   : > { %v1907_v15 = vpop.f32.mrf.mxu0 }
 0x352   : > { %v2093_v16 = vmul.bf16 1009007652, %v2061_v13  ;;  %v2124_v28 = vmax.bf16 %v2092_v43, %v2060_v48 }
 0x353   : > { %v1909_v19 = vpop.f32.mrf.mxu0 }
 0x354   : > { %v1992_v23 = vpack.c.bf16 %v1909_v19, %v1905_v50  ;;  %v2125_v25 = vmax.bf16 %v2093_v16, %v2061_v13 }
 0x355   : > { %v1911_v22 = vpop.f32.mrf.mxu0 }
 0x356   : > { %v2062_v38 = vadd.bf16 %v4450_v26, %v1992_v23  ;;  %v1993_v3 = vpack.c.bf16 %v1911_v22, %v1907_v15  ;;  %2444 = vmatprep.mubr.bf16.mxu1 %v2125_v25 }
 0x357   : > { %v1915_v18 = vpop.f32.mrf.mxu0  ;;  %2445 = vmatmul.mubr.bf16.gmra.mxu1 %v2124_v28 }
 0x358   : > { %v2063_v30 = vadd.bf16 %v4453_v29, %v1993_v3  ;;  %v2094_v31 = vmul.bf16 1009007652, %v2062_v38 }
 0x359   : > { %v1917_v32 = vpop.f32.mrf.mxu0 }
 0x35a   : > { %v2095_v33 = vmul.bf16 1009007652, %v2063_v30  ;;  %v2126_v11 = vmax.bf16 %v2094_v31, %v2062_v38 }
 0x35b   : > { %v1919_v34 = vpop.f32.mrf.mxu0 }
 0x35c   : > { %v1994_v37 = vpack.c.bf16 %v1919_v34, %v1915_v18  ;;  %v2127_v56 = vmax.bf16 %v2095_v33, %v2063_v30 }
 0x35d   : > { %v1921_v6 = vpop.f32.mrf.mxu0 }
 0x35e   : > { %v2064_v40 = vadd.bf16 %v4450_v26, %v1994_v37  ;;  %v1995_v41 = vpack.c.bf16 %v1921_v6, %v1917_v32  ;;  %2454 = vmatprep.mubr.bf16.mxu1 %v2127_v56 }
 0x35f   : > { %v1925_v42 = vpop.f32.mrf.mxu0  ;;  %2455 = vmatmul.mubr.bf16.gmra.mxu1 %v2126_v11 }
 0x360   : > { %v2065_v44 = vadd.bf16 %v4453_v29, %v1995_v41  ;;  %v2096_v45 = vmul.bf16 1009007652, %v2064_v40 }
 0x361   : > { %v1927_v47 = vpop.f32.mrf.mxu0 }
 0x362   : > { %v2097_v49 = vmul.bf16 1009007652, %v2065_v44  ;;  %v2128_v52 = vmax.bf16 %v2096_v45, %v2064_v40 }
 0x363   : > { %v1929_v51 = vpop.f32.mrf.mxu0 }
 0x364   : > { %v1996_v39 = vpack.c.bf16 %v1929_v51, %v1925_v42  ;;  %v2129_v59 = vmax.bf16 %v2097_v49, %v2065_v44  ;;  %v3297_v51 = vld.sshfl [vmem:[%s4623_s8] sm:$0x11 pattern:$0x75316420] }
 0x365   : > { %v1931_v36 = vpop.f32.mrf.mxu0 }
 0x366   : > { %v2066_v53 = vadd.bf16 %v4450_v26, %v1996_v39  ;;  %v1997_v54 = vpack.c.bf16 %v1931_v36, %v1927_v47  ;;  %2464 = vmatprep.mubr.bf16.mxu1 %v2129_v59  ;;  %v2566_v39 = vcombine.high %v3297_v51, %v3297_v51  ;;  %v2573_v59 = vrot.slane %v3297_v51, %v4297_v7 }
 0x367   : > { %v1935_v55 = vpop.f32.mrf.mxu0  ;;  %2465 = vmatmul.mubr.bf16.gmra.mxu1 %v2128_v52 }
 0x368   : > { %v2067_v57 = vadd.bf16 %v4453_v29, %v1997_v54  ;;  %v2098_v58 = vmul.bf16 1009007652, %v2066_v53  ;;  %v2582_v52 = vpack.i.b16 %v2573_v59, %v2573_v59 }
 0x369   : > { %v1937_v60 = vpop.f32.mrf.mxu0 }
 0x36a   : > { %v2099_v17 = vmul.bf16 1009007652, %v2067_v57  ;;  %v2130_v21 = vmax.bf16 %v2098_v58, %v2066_v53 }
 0x36b   : > { %v1939_v24 = vpop.f32.mrf.mxu0 }
 0x36c   : > { %v1998_v61 = vpack.c.bf16 %v1939_v24, %v1935_v55  ;;  %v2131_v62 = vmax.bf16 %v2099_v17, %v2067_v57 }
 0x36d   : > { %v1941_v46 = vpop.f32.mrf.mxu0 }
 0x36e   : > { %v2068_v1 = vadd.bf16 %v4450_v26, %v1998_v61  ;;  %v1999_v2 = vpack.c.bf16 %v1941_v46, %v1937_v60  ;;  %2474 = vmatprep.mubr.bf16.mxu1 %v2131_v62 }
 0x36f   : > { %v1945_v0 = vpop.f32.mrf.mxu0  ;;  %2475 = vmatmul.mubr.bf16.gmra.mxu1 %v2130_v21 }
 0x370   : > { %v2069_v4 = vadd.bf16 %v4453_v29, %v1999_v2  ;;  %v2100_v5 = vmul.bf16 1009007652, %v2068_v1 }
 0x371   : > { %v1947_v8 = vpop.f32.mrf.mxu0 }
 0x372   : > { %v2101_v9 = vmul.bf16 1009007652, %v2069_v4  ;;  %v2132_v35 = vmax.bf16 %v2100_v5, %v2068_v1 }
 0x373   : > { %v1949_v14 = vpop.f32.mrf.mxu0 }
 0x374   : > { %v2000_v20 = vpack.c.bf16 %v1949_v14, %v1945_v0  ;;  %v2133_v63 = vmax.bf16 %v2101_v9, %v2069_v4 }
 0x375   : > { %v1951_v48 = vpop.f32.mrf.mxu0 }
 0x376   : > { %v2070_v10 = vadd.bf16 %v4450_v26, %v2000_v20  ;;  %v2001_v50 = vpack.c.bf16 %v1951_v48, %v1947_v8  ;;  %2484 = vmatprep.mubr.bf16.mxu1 %v2133_v63 }
 0x377   : > { %v1955_v13 = vpop.f32.mrf.mxu0  ;;  %2485 = vmatmul.mubr.bf16.gmra.mxu1 %v2132_v35 }
 0x378   : > { %v2071_v43 = vadd.bf16 %v4453_v29, %v2001_v50  ;;  %v2102_v15 = vmul.bf16 1009007652, %v2070_v10 }
 0x379   : > { %v1957_v16 = vpop.f32.mrf.mxu0 }
 0x37a   : > { %v2103_v19 = vmul.bf16 1009007652, %v2071_v43  ;;  %v2134_v22 = vmax.bf16 %v2102_v15, %v2070_v10 }
 0x37b   : > { %v1959_v23 = vpop.f32.mrf.mxu0 }
 0x37c   : > { %v2002_v25 = vpack.c.bf16 %v1959_v23, %v1955_v13  ;;  %v2135_v28 = vmax.bf16 %v2103_v19, %v2071_v43 }
 0x37d   : > { %v1961_v38 = vpop.f32.mrf.mxu0 }
 0x37e   : > { %v2072_v3 = vadd.bf16 %v4450_v26, %v2002_v25  ;;  %v2003_v18 = vpack.c.bf16 %v1961_v38, %v1957_v16  ;;  %2494 = vmatprep.mubr.bf16.mxu1 %v2135_v28 }
 0x37f   : > { %v1965_v27 = vpop.f32.mrf.mxu0  ;;  %2495 = vmatmul.mubr.bf16.gmra.mxu1 %v2134_v22 }
 0x380   : > { %v2073_v30 = vadd.bf16 %v4453_v29, %v2003_v18  ;;  %v2104_v31 = vmul.bf16 1009007652, %v2072_v3 }
 0x381   : > { %v1967_v32 = vpop.f32.mrf.mxu0 }
 0x382   : > { %v2105_v33 = vmul.bf16 1009007652, %v2073_v30  ;;  %v2136_v11 = vmax.bf16 %v2104_v31, %v2072_v3 }
 0x383   : > { %v1969_v34 = vpop.f32.mrf.mxu0 }
 0x384   : > { %v2004_v37 = vpack.c.bf16 %v1969_v34, %v1965_v27  ;;  %v2137_v56 = vmax.bf16 %v2105_v33, %v2073_v30 }
 0x385   : > { %v1971_v6 = vpop.f32.mrf.mxu0 }
 0x386   : > { %v2074_v40 = vadd.bf16 %v4450_v26, %v2004_v37  ;;  %v2005_v41 = vpack.c.bf16 %v1971_v6, %v1967_v32  ;;  %2504 = vmatprep.mubr.bf16.mxu1 %v2137_v56  ;;  %v2580_v26 = vrot.slane %v2566_v39, %v4297_v7 }
 0x387   : > { %2505 = vmatmul.mubr.bf16.gmra.mxu1 %v2136_v11 }
 0x388   : > { %v2075_v42 = vadd.bf16 %v4453_v29, %v2005_v41  ;;  %v2106_v44 = vmul.bf16 1009007652, %v2074_v40  ;;  %v2589_v53 = vpack.i.b16 %v2580_v26, %v2580_v26  ;;  %v4493_v29 = vrot.slane %v2582_v52, %v4301_v12 }
 0x38a   : > { %v2107_v45 = vmul.bf16 1009007652, %v2075_v42  ;;  %v2138_v49 = vmax.bf16 %v2106_v44, %v2074_v40  ;;  %v4496_v58 = vrot.slane %v2589_v53, %v4301_v12 }
 0x38c   : > { %v2139_v47 = vmax.bf16 %v2107_v45, %v2075_v42 }
 0x38e   : > { %2514 = vmatprep.mubr.bf16.mxu1 %v2139_v47 }
 0x38f   : > { %2515 = vmatmul.mubr.bf16.gmra.mxu1 %v2138_v49 }
 0x3d7   : > { %v2366_v36 = vpop.f32.mrf.mxu1 }
 0x3d9   : > { %v2368_v54 = vpop.f32.mrf.mxu1 }
 0x3db   : > { %v2370_v55 = vpop.f32.mrf.mxu1 }
 0x3dc   : > { %v2525_v57 = vpack.c.bf16 %v2370_v55, %v2366_v36 }
 0x3dd   : > { %v2372_v60 = vpop.f32.mrf.mxu1 }
 0x3de   : > { %v2595_v17 = vadd.bf16 %v4493_v29, %v2525_v57  ;;  %v2526_v24 = vpack.c.bf16 %v2372_v60, %v2368_v54 }
 0x3df   : > { %v2376_v61 = vpop.f32.mrf.mxu1 }
 0x3e0   : > { %v2596_v62 = vadd.bf16 %v4496_v58, %v2526_v24  ;;  %v2627_v7 = vmul.bf16 1009007652, %v2595_v17 }
 0x3e1   : > { %v2378_v21 = vpop.f32.mrf.mxu1 }
 0x3e2   : > { %v2628_v46 = vmul.bf16 1009007652, %v2596_v62  ;;  %v2659_v4 = vmax.bf16 %v2627_v7, %v2595_v17 }
 0x3e3   : > { %v2380_v1 = vpop.f32.mrf.mxu1 }
 0x3e4   : > { %v2527_v2 = vpack.c.bf16 %v2380_v1, %v2376_v61  ;;  %v2660_v0 = vmax.bf16 %v2628_v46, %v2596_v62 }
 0x3e5   : > { %v2382_v5 = vpop.f32.mrf.mxu1 }
 0x3e6   : > { %v2597_v8 = vadd.bf16 %v4493_v29, %v2527_v2  ;;  %v2528_v9 = vpack.c.bf16 %v2382_v5, %v2378_v21  ;;  %2851 = vmatprep.mubr.bf16.mxu0 %v2660_v0 }
 0x3e7   : > { %v2386_v12 = vpop.f32.mrf.mxu1  ;;  %2852 = vmatmul.mubr.bf16.vlgmr.msra.gmra.mxu0 %v2659_v4 }
 0x3e8   : > { %v2598_v14 = vadd.bf16 %v4496_v58, %v2528_v9  ;;  %v2629_v20 = vmul.bf16 1009007652, %v2597_v8 }
 0x3e9   : > { %v2388_v63 = vpop.f32.mrf.mxu1 }
 0x3ea   : > { %v2630_v35 = vmul.bf16 1009007652, %v2598_v14  ;;  %v2661_v43 = vmax.bf16 %v2629_v20, %v2597_v8 }
 0x3eb   : > { %v2390_v48 = vpop.f32.mrf.mxu1 }
 0x3ec   : > { %v2529_v10 = vpack.c.bf16 %v2390_v48, %v2386_v12  ;;  %v2662_v50 = vmax.bf16 %v2630_v35, %v2598_v14 }
 0x3ed   : > { %v2392_v13 = vpop.f32.mrf.mxu1 }
 0x3ee   : > { %v2599_v15 = vadd.bf16 %v4493_v29, %v2529_v10  ;;  %v2530_v16 = vpack.c.bf16 %v2392_v13, %v2388_v63  ;;  %2859 = vmatprep.mubr.bf16.mxu0 %v2662_v50 }
 0x3ef   : > { %v2396_v19 = vpop.f32.mrf.mxu1  ;;  %2860 = vmatmul.mubr.bf16.gmra.mxu0 %v2661_v43 }
 0x3f0   : > { %v2600_v23 = vadd.bf16 %v4496_v58, %v2530_v16  ;;  %v2631_v25 = vmul.bf16 1009007652, %v2599_v15 }
 0x3f1   : > { %v2398_v28 = vpop.f32.mrf.mxu1 }
 0x3f2   : > { %v2632_v22 = vmul.bf16 1009007652, %v2600_v23  ;;  %v2663_v30 = vmax.bf16 %v2631_v25, %v2599_v15 }
 0x3f3   : > { %v2400_v38 = vpop.f32.mrf.mxu1 }
 0x3f4   : > { %v2531_v3 = vpack.c.bf16 %v2400_v38, %v2396_v19  ;;  %v2664_v18 = vmax.bf16 %v2632_v22, %v2600_v23 }
 0x3f5   : > { %v2402_v27 = vpop.f32.mrf.mxu1 }
 0x3f6   : > { %v2601_v31 = vadd.bf16 %v4493_v29, %v2531_v3  ;;  %v2532_v32 = vpack.c.bf16 %v2402_v27, %v2398_v28  ;;  %2867 = vmatprep.mubr.bf16.mxu0 %v2664_v18 }
 0x3f7   : > { %v2406_v33 = vpop.f32.mrf.mxu1  ;;  %2868 = vmatmul.mubr.bf16.gmra.mxu0 %v2663_v30 }
 0x3f8   : > { %v2602_v34 = vadd.bf16 %v4496_v58, %v2532_v32  ;;  %v2633_v37 = vmul.bf16 1009007652, %v2601_v31 }
 0x3f9   : > { %v2408_v56 = vpop.f32.mrf.mxu1 }
 0x3fa   : > { %v2634_v11 = vmul.bf16 1009007652, %v2602_v34  ;;  %v2665_v44 = vmax.bf16 %v2633_v37, %v2601_v31 }
 0x3fb   : > { %v2410_v6 = vpop.f32.mrf.mxu1 }
 0x3fc   : > { %v2533_v40 = vpack.c.bf16 %v2410_v6, %v2406_v33  ;;  %v2666_v41 = vmax.bf16 %v2634_v11, %v2602_v34 }
 0x3fd   : > { %v2412_v42 = vpop.f32.mrf.mxu1 }
 0x3fe   : > { %v2603_v45 = vadd.bf16 %v4493_v29, %v2533_v40  ;;  %v2534_v47 = vpack.c.bf16 %v2412_v42, %v2408_v56  ;;  %2875 = vmatprep.mubr.bf16.mxu0 %v2666_v41 }
 0x3ff   : > { %v2416_v49 = vpop.f32.mrf.mxu1  ;;  %2876 = vmatmul.mubr.bf16.gmra.mxu0 %v2665_v44 }
 0x400   : > { %v2604_v51 = vadd.bf16 %v4496_v58, %v2534_v47  ;;  %v2635_v39 = vmul.bf16 1009007652, %v2603_v45 }
 0x401   : > { %v2418_v59 = vpop.f32.mrf.mxu1 }
 0x402   : > { %v2636_v26 = vmul.bf16 1009007652, %v2604_v51  ;;  %v2667_v54 = vmax.bf16 %v2635_v39, %v2603_v45 }
 0x403   : > { %v2420_v52 = vpop.f32.mrf.mxu1 }
 0x404   : > { %v2535_v36 = vpack.c.bf16 %v2420_v52, %v2416_v49  ;;  %v2668_v53 = vmax.bf16 %v2636_v26, %v2604_v51 }
 0x405   : > { %v2422_v55 = vpop.f32.mrf.mxu1 }
 0x406   : > { %v2605_v57 = vadd.bf16 %v4493_v29, %v2535_v36  ;;  %v2536_v60 = vpack.c.bf16 %v2422_v55, %v2418_v59  ;;  %2883 = vmatprep.mubr.bf16.mxu0 %v2668_v53 }
 0x407   : > { %v2426_v17 = vpop.f32.mrf.mxu1  ;;  %2884 = vmatmul.mubr.bf16.gmra.mxu0 %v2667_v54 }
 0x408   : > { %v2606_v24 = vadd.bf16 %v4496_v58, %v2536_v60  ;;  %v2637_v61 = vmul.bf16 1009007652, %v2605_v57 }
 0x409   : > { %v2428_v62 = vpop.f32.mrf.mxu1 }
 0x40a   : > { %v2638_v7 = vmul.bf16 1009007652, %v2606_v24  ;;  %v2669_v2 = vmax.bf16 %v2637_v61, %v2605_v57 }
 0x40b   : > { %v2430_v21 = vpop.f32.mrf.mxu1 }
 0x40c   : > { %v2537_v46 = vpack.c.bf16 %v2430_v21, %v2426_v17  ;;  %v2670_v1 = vmax.bf16 %v2638_v7, %v2606_v24 }
 0x40d   : > { %v2432_v0 = vpop.f32.mrf.mxu1 }
 0x40e   : > { %v2607_v4 = vadd.bf16 %v4493_v29, %v2537_v46  ;;  %v2538_v5 = vpack.c.bf16 %v2432_v0, %v2428_v62  ;;  %2891 = vmatprep.mubr.bf16.mxu0 %v2670_v1 }
 0x40f   : > { %v2436_v8 = vpop.f32.mrf.mxu1  ;;  %2892 = vmatmul.mubr.bf16.gmra.mxu0 %v2669_v2 }
 0x410   : > { %v2608_v9 = vadd.bf16 %v4496_v58, %v2538_v5  ;;  %v2639_v12 = vmul.bf16 1009007652, %v2607_v4 }
 0x411   : > { %v2438_v14 = vpop.f32.mrf.mxu1 }
 0x412   : > { %v2640_v20 = vmul.bf16 1009007652, %v2608_v9  ;;  %v2671_v10 = vmax.bf16 %v2639_v12, %v2607_v4 }
 0x413   : > { %v2440_v63 = vpop.f32.mrf.mxu1 }
 0x414   : > { %v2539_v35 = vpack.c.bf16 %v2440_v63, %v2436_v8  ;;  %v2672_v48 = vmax.bf16 %v2640_v20, %v2608_v9 }
 0x415   : > { %v2442_v50 = vpop.f32.mrf.mxu1 }
 0x416   : > { %v2609_v13 = vadd.bf16 %v4493_v29, %v2539_v35  ;;  %v2540_v43 = vpack.c.bf16 %v2442_v50, %v2438_v14  ;;  %2899 = vmatprep.mubr.bf16.mxu0 %v2672_v48 }
 0x417   : > { %v2446_v15 = vpop.f32.mrf.mxu1  ;;  %2900 = vmatmul.mubr.bf16.gmra.mxu0 %v2671_v10 }
 0x418   : > { %v2610_v16 = vadd.bf16 %v4496_v58, %v2540_v43  ;;  %v2641_v19 = vmul.bf16 1009007652, %v2609_v13 }
 0x419   : > { %v2448_v23 = vpop.f32.mrf.mxu1 }
 0x41a   : > { %v2642_v25 = vmul.bf16 1009007652, %v2610_v16  ;;  %v2673_v3 = vmax.bf16 %v2641_v19, %v2609_v13 }
 0x41b   : > { %v2450_v28 = vpop.f32.mrf.mxu1 }
 0x41c   : > { %v2541_v22 = vpack.c.bf16 %v2450_v28, %v2446_v15  ;;  %v2674_v38 = vmax.bf16 %v2642_v25, %v2610_v16 }
 0x41d   : > { %v2452_v18 = vpop.f32.mrf.mxu1 }
 0x41e   : > { %v2611_v27 = vadd.bf16 %v4493_v29, %v2541_v22  ;;  %v2542_v30 = vpack.c.bf16 %v2452_v18, %v2448_v23  ;;  %2907 = vmatprep.mubr.bf16.mxu0 %v2674_v38 }
 0x41f   : > { %v2456_v31 = vpop.f32.mrf.mxu1  ;;  %2908 = vmatmul.mubr.bf16.gmra.mxu0 %v2673_v3 }
 0x420   : > { %v2612_v32 = vadd.bf16 %v4496_v58, %v2542_v30  ;;  %v2643_v33 = vmul.bf16 1009007652, %v2611_v27 }
 0x421   : > { %v2458_v34 = vpop.f32.mrf.mxu1 }
 0x422   : > { %v2644_v37 = vmul.bf16 1009007652, %v2612_v32  ;;  %v2675_v40 = vmax.bf16 %v2643_v33, %v2611_v27 }
 0x423   : > { %v2460_v56 = vpop.f32.mrf.mxu1 }
 0x424   : > { %v2543_v11 = vpack.c.bf16 %v2460_v56, %v2456_v31  ;;  %v2676_v6 = vmax.bf16 %v2644_v37, %v2612_v32 }
 0x425   : > { %v2462_v41 = vpop.f32.mrf.mxu1 }
 0x426   : > { %v2613_v42 = vadd.bf16 %v4493_v29, %v2543_v11  ;;  %v2544_v44 = vpack.c.bf16 %v2462_v41, %v2458_v34  ;;  %2915 = vmatprep.mubr.bf16.mxu0 %v2676_v6 }
 0x427   : > { %v2466_v45 = vpop.f32.mrf.mxu1  ;;  %2916 = vmatmul.mubr.bf16.gmra.mxu0 %v2675_v40 }
 0x428   : > { %v2614_v47 = vadd.bf16 %v4496_v58, %v2544_v44  ;;  %v2645_v49 = vmul.bf16 1009007652, %v2613_v42 }
 0x429   : > { %v2468_v51 = vpop.f32.mrf.mxu1 }
 0x42a   : > { %v2646_v39 = vmul.bf16 1009007652, %v2614_v47  ;;  %v2677_v36 = vmax.bf16 %v2645_v49, %v2613_v42 }
 0x42b   : > { %v2470_v59 = vpop.f32.mrf.mxu1 }
 0x42c   : > { %v2545_v26 = vpack.c.bf16 %v2470_v59, %v2466_v45  ;;  %v2678_v52 = vmax.bf16 %v2646_v39, %v2614_v47 }
 0x42d   : > { %v2472_v53 = vpop.f32.mrf.mxu1 }
 0x42e   : > { %v2615_v54 = vadd.bf16 %v4493_v29, %v2545_v26  ;;  %v2546_v55 = vpack.c.bf16 %v2472_v53, %v2468_v51  ;;  %2923 = vmatprep.mubr.bf16.mxu0 %v2678_v52 }
 0x42f   : > { %v2476_v57 = vpop.f32.mrf.mxu1  ;;  %2924 = vmatmul.mubr.bf16.gmra.mxu0 %v2677_v36 }
 0x430   : > { %v2616_v60 = vadd.bf16 %v4496_v58, %v2546_v55  ;;  %v2647_v17 = vmul.bf16 1009007652, %v2615_v54 }
 0x431   : > { %v2478_v24 = vpop.f32.mrf.mxu1 }
 0x432   : > { %v2648_v61 = vmul.bf16 1009007652, %v2616_v60  ;;  %v2679_v46 = vmax.bf16 %v2647_v17, %v2615_v54 }
 0x433   : > { %v2480_v62 = vpop.f32.mrf.mxu1 }
 0x434   : > { %v2547_v7 = vpack.c.bf16 %v2480_v62, %v2476_v57  ;;  %v2680_v21 = vmax.bf16 %v2648_v61, %v2616_v60 }
 0x435   : > { %v2482_v1 = vpop.f32.mrf.mxu1 }
 0x436   : > { %v2617_v2 = vadd.bf16 %v4493_v29, %v2547_v7  ;;  %v2548_v0 = vpack.c.bf16 %v2482_v1, %v2478_v24  ;;  %2931 = vmatprep.mubr.bf16.mxu0 %v2680_v21 }
 0x437   : > { %v2486_v4 = vpop.f32.mrf.mxu1  ;;  %2932 = vmatmul.mubr.bf16.gmra.mxu0 %v2679_v46 }
 0x438   : > { %v2618_v5 = vadd.bf16 %v4496_v58, %v2548_v0  ;;  %v2649_v8 = vmul.bf16 1009007652, %v2617_v2 }
 0x439   : > { %v2488_v9 = vpop.f32.mrf.mxu1 }
 0x43a   : > { %v2650_v12 = vmul.bf16 1009007652, %v2618_v5  ;;  %v2681_v35 = vmax.bf16 %v2649_v8, %v2617_v2 }
 0x43b   : > { %v2490_v14 = vpop.f32.mrf.mxu1 }
 0x43c   : > { %v2549_v20 = vpack.c.bf16 %v2490_v14, %v2486_v4  ;;  %v2682_v63 = vmax.bf16 %v2650_v12, %v2618_v5 }
 0x43d   : > { %v2492_v48 = vpop.f32.mrf.mxu1 }
 0x43e   : > { %v2619_v10 = vadd.bf16 %v4493_v29, %v2549_v20  ;;  %v2550_v50 = vpack.c.bf16 %v2492_v48, %v2488_v9  ;;  %2939 = vmatprep.mubr.bf16.mxu0 %v2682_v63 }
 0x43f   : > { %v2496_v13 = vpop.f32.mrf.mxu1  ;;  %2940 = vmatmul.mubr.bf16.gmra.mxu0 %v2681_v35 }
 0x440   : > { %v2620_v43 = vadd.bf16 %v4496_v58, %v2550_v50  ;;  %v2651_v15 = vmul.bf16 1009007652, %v2619_v10 }
 0x441   : > { %v2498_v16 = vpop.f32.mrf.mxu1 }
 0x442   : > { %v2652_v19 = vmul.bf16 1009007652, %v2620_v43  ;;  %v2683_v22 = vmax.bf16 %v2651_v15, %v2619_v10 }
 0x443   : > { %v2500_v23 = vpop.f32.mrf.mxu1 }
 0x444   : > { %v2551_v25 = vpack.c.bf16 %v2500_v23, %v2496_v13  ;;  %v2684_v28 = vmax.bf16 %v2652_v19, %v2620_v43 }
 0x445   : > { %v2502_v38 = vpop.f32.mrf.mxu1 }
 0x446   : > { %v2621_v3 = vadd.bf16 %v4493_v29, %v2551_v25  ;;  %v2552_v18 = vpack.c.bf16 %v2502_v38, %v2498_v16  ;;  %2947 = vmatprep.mubr.bf16.mxu0 %v2684_v28 }
 0x447   : > { %v2506_v27 = vpop.f32.mrf.mxu1  ;;  %2948 = vmatmul.mubr.bf16.gmra.mxu0 %v2683_v22 }
 0x448   : > { %v2622_v30 = vadd.bf16 %v4496_v58, %v2552_v18  ;;  %v2653_v31 = vmul.bf16 1009007652, %v2621_v3 }
 0x449   : > { %v2508_v32 = vpop.f32.mrf.mxu1 }
 0x44a   : > { %v2654_v33 = vmul.bf16 1009007652, %v2622_v30  ;;  %v2685_v11 = vmax.bf16 %v2653_v31, %v2621_v3 }
 0x44b   : > { %v2510_v34 = vpop.f32.mrf.mxu1 }
 0x44c   : > { %v2553_v37 = vpack.c.bf16 %v2510_v34, %v2506_v27  ;;  %v2686_v56 = vmax.bf16 %v2654_v33, %v2622_v30 }
 0x44d   : > { %v2512_v6 = vpop.f32.mrf.mxu1 }
 0x44e   : > { %v2623_v40 = vadd.bf16 %v4493_v29, %v2553_v37  ;;  %v2554_v41 = vpack.c.bf16 %v2512_v6, %v2508_v32  ;;  %2955 = vmatprep.mubr.bf16.mxu0 %v2686_v56 }
 0x44f   : > { %v2516_v42 = vpop.f32.mrf.mxu1  ;;  %2956 = vmatmul.mubr.bf16.gmra.mxu0 %v2685_v11 }
 0x450   : > { %v2624_v44 = vadd.bf16 %v4496_v58, %v2554_v41  ;;  %v2655_v45 = vmul.bf16 1009007652, %v2623_v40 }
 0x451   : > { %v2518_v47 = vpop.f32.mrf.mxu1 }
 0x452   : > { %v2656_v49 = vmul.bf16 1009007652, %v2624_v44  ;;  %v2687_v26 = vmax.bf16 %v2655_v45, %v2623_v40 }
 0x453   : > { %v2520_v51 = vpop.f32.mrf.mxu1 }
 0x454   : > { %v2555_v39 = vpack.c.bf16 %v2520_v51, %v2516_v42  ;;  %v2688_v59 = vmax.bf16 %v2656_v49, %v2624_v44 }
 0x455   : > { %v2522_v52 = vpop.f32.mrf.mxu1 }
 0x456   : > { %v2625_v36 = vadd.bf16 %v4493_v29, %v2555_v39  ;;  %v2556_v53 = vpack.c.bf16 %v2522_v52, %v2518_v47  ;;  %2963 = vmatprep.mubr.bf16.mxu0 %v2688_v59 }
 0x457   : > { %2964 = vmatmul.mubr.bf16.gmra.mxu0 %v2687_v26 }
 0x458   : > { %v2626_v54 = vadd.bf16 %v4496_v58, %v2556_v53  ;;  %v2657_v55 = vmul.bf16 1009007652, %v2625_v36 }
 0x45a   : > { %v2658_v57 = vmul.bf16 1009007652, %v2626_v54  ;;  %v2689_v17 = vmax.bf16 %v2657_v55, %v2625_v36 }
 0x45c   : > { %v2690_v60 = vmax.bf16 %v2658_v57, %v2626_v54 }
 0x45e   : > { %2971 = vmatprep.mubr.bf16.mxu0 %v2690_v60 }
 0x45f   : > { %2972 = vmatmul.mubr.bf16.gmra.mxu0 %v2689_v17 }
 0x4a7   : > { %v3337_v24 = vpop.f32.mrf.mxu0 }
 0x4a9   : > { %v3338_v61 = vpop.f32.mrf.mxu0 }
 0x4aa   : > { %v3339_v62 = vadd.f32 %v3338_v61, %v3337_v24 }
 0x4ab   : > { %v3340_v7 = vpop.f32.mrf.mxu0 }
 0x4ac   : > { %2980 = vst [vmem:[%s4531_s3] sm:$0xff] %v3339_v62 }
 0x4ad   : > { %v3341_v29 = vpop.f32.mrf.mxu0 }
 0x4ae   : > { %v3342_v58 = vadd.f32 %v3341_v29, %v3340_v7 }
 0x4af   : > { %v3343_v21 = vpop.f32.mrf.mxu0 }
 0x4b0   : > { %2981 = vst [vmem:[%s4531_s3 + $0x8] sm:$0xff] %v3342_v58 }
 0x4b1   : > { %v3344_v46 = vpop.f32.mrf.mxu0 }
 0x4b2   : > { %v3345_v1 = vadd.f32 %v3344_v46, %v3343_v21 }
 0x4b3   : > { %v3346_v2 = vpop.f32.mrf.mxu0 }
 0x4b4   : > { %2982 = vst [vmem:[%s4531_s3 + $0x10] sm:$0xff] %v3345_v1 }
 0x4b5   : > { %v3347_v0 = vpop.f32.mrf.mxu0 }
 0x4b6   : > { %v3348_v4 = vadd.f32 %v3347_v0, %v3346_v2 }
 0x4b7   : > { %v3349_v5 = vpop.f32.mrf.mxu0 }
 0x4b8   : > { %2983 = vst [vmem:[%s4531_s3 + $0x18] sm:$0xff] %v3348_v4 }
 0x4b9   : > { %v3350_v8 = vpop.f32.mrf.mxu0 }
 0x4ba   : > { %v3351_v9 = vadd.f32 %v3350_v8, %v3349_v5 }
 0x4bb   : > { %v3352_v12 = vpop.f32.mrf.mxu0 }
 0x4bc   : > { %2984 = vst [vmem:[%s4531_s3 + $0x20] sm:$0xff] %v3351_v9 }
 0x4bd   : > { %v3353_v14 = vpop.f32.mrf.mxu0 }
 0x4be   : > { %v3354_v20 = vadd.f32 %v3353_v14, %v3352_v12 }
 0x4bf   : > { %v3355_v63 = vpop.f32.mrf.mxu0 }
 0x4c0   : > { %2985 = vst [vmem:[%s4531_s3 + $0x28] sm:$0xff] %v3354_v20 }
 0x4c1   : > { %v3356_v35 = vpop.f32.mrf.mxu0 }
 0x4c2   : > { %v3357_v48 = vadd.f32 %v3356_v35, %v3355_v63 }
 0x4c3   : > { %v3358_v10 = vpop.f32.mrf.mxu0 }
 0x4c4   : > { %2986 = vst [vmem:[%s4531_s3 + $0x30] sm:$0xff] %v3357_v48 }
 0x4c5   : > { %v3359_v50 = vpop.f32.mrf.mxu0 }
 0x4c6   : > { %v3360_v13 = vadd.f32 %v3359_v50, %v3358_v10 }
 0x4c7   : > { %v3361_v43 = vpop.f32.mrf.mxu0 }
 0x4c8   : > { %2987 = vst [vmem:[%s4531_s3 + $0x38] sm:$0xff] %v3360_v13 }
 0x4c9   : > { %v3362_v15 = vpop.f32.mrf.mxu0 }
 0x4ca   : > { %v3363_v16 = vadd.f32 %v3362_v15, %v3361_v43 }
 0x4cb   : > { %v3364_v19 = vpop.f32.mrf.mxu0 }
 0x4cc   : > { %2988 = vst [vmem:[%s4531_s3 + $0x40] sm:$0xff] %v3363_v16 }
 0x4cd   : > { %v3365_v23 = vpop.f32.mrf.mxu0 }
 0x4ce   : > { %v3366_v25 = vadd.f32 %v3365_v23, %v3364_v19 }
 0x4cf   : > { %v3367_v28 = vpop.f32.mrf.mxu0 }
 0x4d0   : > { %2989 = vst [vmem:[%s4531_s3 + $0x48] sm:$0xff] %v3366_v25 }
 0x4d1   : > { %v3368_v22 = vpop.f32.mrf.mxu0 }
 0x4d2   : > { %v3369_v38 = vadd.f32 %v3368_v22, %v3367_v28 }
 0x4d3   : > { %v3370_v3 = vpop.f32.mrf.mxu0 }
 0x4d4   : > { %2990 = vst [vmem:[%s4531_s3 + $0x50] sm:$0xff] %v3369_v38 }
 0x4d5   : > { %v3371_v18 = vpop.f32.mrf.mxu0 }
 0x4d6   : > { %v3372_v27 = vadd.f32 %v3371_v18, %v3370_v3 }
 0x4d7   : > { %v3373_v30 = vpop.f32.mrf.mxu0 }
 0x4d8   : > { %2991 = vst [vmem:[%s4531_s3 + $0x58] sm:$0xff] %v3372_v27 }
 0x4d9   : > { %v3374_v31 = vpop.f32.mrf.mxu0 }
 0x4da   : > { %v3375_v32 = vadd.f32 %v3374_v31, %v3373_v30 }
 0x4db   : > { %v3376_v33 = vpop.f32.mrf.mxu0 }
 0x4dc   : > { %2992 = vst [vmem:[%s4531_s3 + $0x60] sm:$0xff] %v3375_v32 }
 0x4dd   : > { %v3377_v34 = vpop.f32.mrf.mxu0 }
 0x4de   : > { %v3378_v37 = vadd.f32 %v3377_v34, %v3376_v33 }
 0x4df   : > { %v3379_v56 = vpop.f32.mrf.mxu0 }
 0x4e0   : > { %2993 = vst [vmem:[%s4531_s3 + $0x68] sm:$0xff] %v3378_v37 }
 0x4e1   : > { %v3380_v11 = vpop.f32.mrf.mxu0 }
 0x4e2   : > { %v3381_v6 = vadd.f32 %v3380_v11, %v3379_v56 }
 0x4e3   : > { %v3382_v40 = vpop.f32.mrf.mxu0 }
 0x4e4   : > { %2994 = vst [vmem:[%s4531_s3 + $0x70] sm:$0xff] %v3381_v6 }
 0x4e5   : > { %v3383_v41 = vpop.f32.mrf.mxu0 }
 0x4e6   : > { %v3384_v42 = vadd.f32 %v3383_v41, %v3382_v40 }
 0x4e7   : > { %v3385_v44 = vpop.f32.mrf.mxu0 }
 0x4e8   : > { %2995 = vst [vmem:[%s4531_s3 + $0x78] sm:$0xff] %v3384_v42 }
 0x4e9   : > { %v3386_v45 = vpop.f32.mrf.mxu0 }
 0x4ea   : > { %v3387_v47 = vadd.f32 %v3386_v45, %v3385_v44 }
 0x4eb   : > { %v3388_v49 = vpop.f32.mrf.mxu0 }
 0x4ec   : > { %2996 = vst [vmem:[%s4531_s3 + $0x80] sm:$0xff] %v3387_v47 }
 0x4ed   : > { %v3389_v51 = vpop.f32.mrf.mxu0 }
 0x4ee   : > { %v3390_v39 = vadd.f32 %v3389_v51, %v3388_v49 }
 0x4ef   : > { %v3391_v59 = vpop.f32.mrf.mxu0 }
 0x4f0   : > { %2997 = vst [vmem:[%s4531_s3 + $0x88] sm:$0xff] %v3390_v39 }
 0x4f1   : > { %v3392_v26 = vpop.f32.mrf.mxu0 }
 0x4f2   : > { %v3393_v52 = vadd.f32 %v3392_v26, %v3391_v59 }
 0x4f3   : > { %v3394_v36 = vpop.f32.mrf.mxu0 }
 0x4f4   : > { %2998 = vst [vmem:[%s4531_s3 + $0x90] sm:$0xff] %v3393_v52 }
 0x4f5   : > { %v3395_v53 = vpop.f32.mrf.mxu0 }
 0x4f6   : > { %v3396_v54 = vadd.f32 %v3395_v53, %v3394_v36 }
 0x4f7   : > { %v3397_v55 = vpop.f32.mrf.mxu0 }
 0x4f8   : > { %2999 = vst [vmem:[%s4531_s3 + $0x98] sm:$0xff] %v3396_v54 }
 0x4f9   : > { %v3398_v57 = vpop.f32.mrf.mxu0 }
 0x4fa   : > { %v3399_v60 = vadd.f32 %v3398_v57, %v3397_v55 }
 0x4fb   : > { %v3400_v17 = vpop.f32.mrf.mxu0 }
 0x4fc   : > { %3000 = vst [vmem:[%s4531_s3 + $0xa0] sm:$0xff] %v3399_v60 }
 0x4fd   : > { %v3401_v24 = vpop.f32.mrf.mxu0 }
 0x4fe   : > { %v3402_v61 = vadd.f32 %v3401_v24, %v3400_v17 }
 0x4ff   : > { %v3403_v62 = vpop.f32.mrf.mxu0 }
 0x500   : > { %3001 = vst [vmem:[%s4531_s3 + $0xa8] sm:$0xff] %v3402_v61 }
 0x501   : > { %v3404_v7 = vpop.f32.mrf.mxu0 }
 0x502   : > { %v3405_v29 = vadd.f32 %v3404_v7, %v3403_v62 }
 0x503   : > { %v3406_v58 = vpop.f32.mrf.mxu0 }
 0x504   : > { %3002 = vst [vmem:[%s4531_s3 + $0xb0] sm:$0xff] %v3405_v29 }
 0x505   : > { %v3407_v21 = vpop.f32.mrf.mxu0 }
 0x506   : > { %v3408_v46 = vadd.f32 %v3407_v21, %v3406_v58 }
 0x507   : > { %v3409_v1 = vpop.f32.mrf.mxu0 }
 0x508   : > { %3003 = vst [vmem:[%s4531_s3 + $0xb8] sm:$0xff] %v3408_v46 }
 0x509   : > { %v3410_v2 = vpop.f32.mrf.mxu0 }
 0x50a   : > { %v3411_v0 = vadd.f32 %v3410_v2, %v3409_v1 }
 0x50b   : > { %v3412_v4 = vpop.f32.mrf.mxu0 }
 0x50c   : > { %3004 = vst [vmem:[%s4531_s3 + $0xc0] sm:$0xff] %v3411_v0 }
 0x50d   : > { %v3413_v5 = vpop.f32.mrf.mxu0 }
 0x50e   : > { %v3414_v8 = vadd.f32 %v3413_v5, %v3412_v4 }
 0x50f   : > { %v3415_v9 = vpop.f32.mrf.mxu0 }
 0x510   : > { %3005 = vst [vmem:[%s4531_s3 + $0xc8] sm:$0xff] %v3414_v8 }
 0x511   : > { %v3416_v12 = vpop.f32.mrf.mxu0 }
 0x512   : > { %v3417_v14 = vadd.f32 %v3416_v12, %v3415_v9 }
 0x513   : > { %v3418_v20 = vpop.f32.mrf.mxu0 }
 0x514   : > { %3006 = vst [vmem:[%s4531_s3 + $0xd0] sm:$0xff] %v3417_v14 }
 0x515   : > { %v3419_v63 = vpop.f32.mrf.mxu0 }
 0x516   : > { %v3420_v35 = vadd.f32 %v3419_v63, %v3418_v20 }
 0x517   : > { %v3421_v48 = vpop.f32.mrf.mxu0 }
 0x518   : > { %3007 = vst [vmem:[%s4531_s3 + $0xd8] sm:$0xff] %v3420_v35 }
 0x519   : > { %v3422_v10 = vpop.f32.mrf.mxu0 }
 0x51a   : > { %v3423_v50 = vadd.f32 %v3422_v10, %v3421_v48 }
 0x51b   : > { %v3424_v13 = vpop.f32.mrf.mxu0 }
 0x51c   : > { %3008 = vst [vmem:[%s4531_s3 + $0xe0] sm:$0xff] %v3423_v50 }
 0x51d   : > { %v3425_v43 = vpop.f32.mrf.mxu0 }
 0x51e   : > { %v3426_v15 = vadd.f32 %v3425_v43, %v3424_v13 }
 0x51f   : > { %v3427_v16 = vpop.f32.mrf.mxu0 }
 0x520   : > { %3009 = vst [vmem:[%s4531_s3 + $0xe8] sm:$0xff] %v3426_v15 }
 0x521   : > { %v3428_v19 = vpop.f32.mrf.mxu0 }
 0x522   : > { %v3429_v23 = vadd.f32 %v3428_v19, %v3427_v16 }
 0x523   : > { %v3430_v25 = vpop.f32.mrf.mxu0 }
 0x524   : > { %3010 = vst [vmem:[%s4531_s3 + $0xf0] sm:$0xff] %v3429_v23 }
 0x525   : > { %v3431_v28 = vpop.f32.mrf.mxu0 }
 0x526   : > { %v3432_v22 = vadd.f32 %v3431_v28, %v3430_v25 }
 0x528   : > { %3011 = vst [vmem:[%s4531_s3 + $0xf8] sm:$0xff] %v3432_v22 }
 0x529   : > { %3925 = shalt.err (!%p3922_p3)
}
 0x52a   : > { %s3926_s27 = scalar_lea.hbm %s4569_s1, 4096  ;;  %s3930_s28 = scalar_lea.hbm %s4625_s10, 8192 }
 0x52b   : > { %p3927_p4 = scmp.ne.s32.totalorder %s4569_s1, %s3926_s27  ;;  %p3931_p2 = scmp.lt.s32.totalorder %s4569_s1, %s4625_s10 }
 0x52c   : > { %p3932_p7 = scmp.lt.s32.totalorder %s3930_s28, %s3926_s27 }
 0x52d   : > { %p3928_p12 = pnand %p3927_p4, %p4657_p11 }
 0x52e   : > { %p3933_p8 = por %p3932_p7, %p3931_p2 }
 0x52f   : > { %p3929_p6 = pneg %p3928_p12 }
 0x531   : > { %p3934_p10 = pnand %p3933_p8, %p3929_p6 }
 0x533   : > { %3937 = shalt.err (!%p3934_p10)
}
 0x534   : > { %s4003_s18 = smov 128   ;;  %s4004_s24 = smov 8  }
 0x535   : > { %3471 = dma.vmem_to_hbm [thread:$0]  (%p4657_p11), %s4571_s7, 4096, %s4569_s1, %s3013_s20, %s4003_s18, %s4003_s18, %s4004_s24  }
 0x536 PF: > { %s3041_s26 = sand.u32 1, %s3976_s13   ;;  %p4658_p0 = scmp.ne.s32.totalorder %s4645_s21, 0 }
 0x537   : > { %p4659_p13 = scmp.ge.s32.totalorder %s3988_s16, 2  ;;  %s3042_s19 = scalar_lea.sflag [#allocation4], %s3041_s26 }
 0x539   : > { %p3494_p5 = pnand %p4659_p13, %p4658_p0 }
 0x53b   : > { %p3495_p9 = pneg %p3494_p5 }
 0x53d   : > { %3971 = dma.done.wait (%p3495_p9), %s3042_s19, 4096  }
 0x53e   : > { %3973 = vsyncadd (%p3495_p9), %s3042_s19, 4294963200  ;;  %p26_p1 = scmp.ge.s32.totalorder %s4171_s22, 4   ;;  %s4660_s13 = smov %s3980_s14 }
 0x53f   : > { %s4661_s14 = smov %s3984_s15  ;;  %s4662_s15 = smov %s4183_s23 }
 0x540   : > { %s4663_s16 = smov %s4171_s22  ;;  %28 = sbr.rel (!%p26_p1) target bundleno = 13 (0xd), region = 125 }
 0x545   :  { %3047 = vsyncpa [#allocation3], 1 }
 0x546   :  { %3049 = vsyncpa [#allocation3 + $0x1], 1 }
 0x547   :  { %3050 = vsyncpa [#allocation6], 1 }
 0x548   :  { %3051 = vsyncpa [#allocation9], 1 }
 0x549   :  { %3052 = vsyncpa [#allocation12], 1 }
 0x54a   :  { %3053 = vsyncpa [#allocation4], 1 }
 0x54b   :  { %3055 = vsyncpa [#allocation4 + $0x1], 1 }

</bundles_post_ra>
